<compile_context>
chip_gen: v7x
topology: tpu7x:2x2x1
jax: 0.10.0
libtpu: 0.0.40
codegen_flags: <defaults>
</compile_context>

<pallas_src>
import functools

import jax
import jax.numpy as jnp
from jax import lax
from jax.experimental import pallas as pl
from jax.experimental.pallas import tpu as pltpu

EPS = 1e-5
ACT_DTYPE = jnp.bfloat16      # storage / matmul dtype for activations & weights


# ---------------------------------------------------------------------------
# Pallas kernels (channels-major: blocks are (C, pixels), pixels on lanes)
# ---------------------------------------------------------------------------

def conv1_kernel(x_ref, w1_ref, h1_ref, st_ref):
    """1x1 conv (64->32) + BN1 partial stats accumulated in a VMEM-resident
    output block (st block index is constant over the pixel-tile axis)."""
    @pl.when(pl.program_id(1) == 0)
    def _():
        st_ref[...] = jnp.zeros_like(st_ref)

    xb = x_ref[0].astype(ACT_DTYPE)                                   # (64, TM)
    h = jnp.dot(w1_ref[...], xb, preferred_element_type=jnp.float32)  # (32, TM)
    hq = h.astype(ACT_DTYPE)
    h1_ref[0] = hq
    hf = hq.astype(jnp.float32)          # stats of the values pass 2 will read
    st_ref[0, :, 0:1] += jnp.sum(hf, axis=1, keepdims=True)
    st_ref[0, :, 1:2] += jnp.sum(hf * hf, axis=1, keepdims=True)


def conv2_kernel(h1_ref, col_ref, w2_ref, s1_ref, t1_ref,
                 h2_ref, st_ref, ext_ref, *, W, HW, MARG):
    """BN1(affine)+ReLU + 3x3 conv as 9 accumulated (32,32)@(32,HW) matmuls
    over lane-shifted views of a zero-haloed VMEM copy of the activations,
    + BN2 partial stats.  No padded HBM layout, no junk columns."""
    # Zero the halo margins (cheap; keeps the kernel safe under megacore
    # partitioning of the batch axis -- no reliance on a "first step" init).
    zmarg = jnp.zeros((32, MARG), ACT_DTYPE)
    ext_ref[:, :MARG] = zmarg
    ext_ref[:, MARG + HW:] = zmarg

    # BN1 apply + ReLU in f32, store bf16 into the centre of the halo buffer.
    h1 = h1_ref[0].astype(jnp.float32)                                # (32, HW)
    act = jnp.maximum(h1 * s1_ref[...] + t1_ref[...], 0.0)
    ext_ref[:, MARG:MARG + HW] = act.astype(ACT_DTYPE)

    col = col_ref[...]                                                # (1, HW) i32
    mask_l = col >= 1           # valid outputs for kx = -1 taps
    mask_r = col <= W - 2       # valid outputs for kx = +1 taps

    acc = None
    for ky in (-1, 0, 1):
        for kx in (-1, 0, 1):
            d = ky * W + kx                                           # static
            tap = ext_ref[:, MARG + d:MARG + d + HW]                  # (32, HW)
            if kx == -1:
                tap = jnp.where(mask_l, tap, 0)
            elif kx == 1:
                tap = jnp.where(mask_r, tap, 0)
            w = w2_ref[3 * (ky + 1) + (kx + 1)]                       # (32, 32)
            c = jnp.dot(w, tap, preferred_element_type=jnp.float32)   # (32, HW)
            acc = c if acc is None else acc + c

    accq = acc.astype(ACT_DTYPE)
    h2_ref[0] = accq
    af = accq.astype(jnp.float32)        # stats of the values passes 3/4 read
    st_ref[0, :, 0:1] = jnp.sum(af, axis=1, keepdims=True)
    st_ref[0, :, 1:2] = jnp.sum(af * af, axis=1, keepdims=True)


def conv3_stats_kernel(h2_ref, w3_ref, s2_ref, t2_ref, st_ref):
    """BN2(affine)+ReLU + 1x1 conv (32->64), emitting ONLY BN3 partial stats
    (z itself is never written to HBM; pass 4 recomputes it)."""
    @pl.when(pl.program_id(1) == 0)
    def _():
        st_ref[...] = jnp.zeros_like(st_ref)

    h2 = h2_ref[0].astype(jnp.float32)                                # (32, TM)
    act = jnp.maximum(h2 * s2_ref[...] + t2_ref[...], 0.0).astype(ACT_DTYPE)
    z = jnp.dot(w3_ref[...], act, preferred_element_type=jnp.float32)  # (64, TM)
    st_ref[0, :, 0:1] += jnp.sum(z, axis=1, keepdims=True)
    st_ref[0, :, 1:2] += jnp.sum(z * z, axis=1, keepdims=True)


def conv3_bn3_res_kernel(h2_ref, x_ref, w3_ref, s2_ref, t2_ref,
                         s3_ref, t3_ref, out_ref):
    """Recompute BN2+ReLU + conv3 (bit-identical to pass 3), apply BN3 as a
    precomputed affine, add the residual.  All normalization math in f32."""
    h2 = h2_ref[0].astype(jnp.float32)                                # (32, TM)
    act = jnp.maximum(h2 * s2_ref[...] + t2_ref[...], 0.0).astype(ACT_DTYPE)
    z = jnp.dot(w3_ref[...], act, preferred_element_type=jnp.float32)  # (64, TM)
    out_ref[0] = z * s3_ref[...] + t3_ref[...] + x_ref[0]


# ---------------------------------------------------------------------------
# JAX-side helpers
# ---------------------------------------------------------------------------

def _scale_shift(sums, sumsqs, count, gamma, beta):
    # Training-mode BN moments -> per-channel affine so kernels do h*s + t.
    mean = sums / count
    var = jnp.maximum(sumsqs / count - mean * mean, 0.0)   # biased variance
    s = gamma * lax.rsqrt(var + EPS)
    t = beta - mean * s
    return (s.reshape(-1, 1).astype(jnp.float32),
            t.reshape(-1, 1).astype(jnp.float32))


def _vmem_cap_bytes():
    """Generation-aware usable VMEM: ~3/4 of physical (96 MiB on v5e/v6e,
    48 MiB on v7x); conservative 48 MiB when detection is unavailable."""
    phys = 64 * 2**20
    try:
        info = pltpu.get_tpu_info()
        phys = int(getattr(info, "vmem_capacity_bytes", phys)) or phys
    except Exception:
        pass
    return (phys * 3) // 4


def _cparams(sem, working_set_bytes):
    cap = _vmem_cap_bytes()
    limit = int(min(cap, max(32 * 2**20, int(working_set_bytes) + 16 * 2**20)))
    return pltpu.CompilerParams(dimension_semantics=sem, vmem_limit_bytes=limit)


def _pick_tile(hw, target):
    """Largest divisor of hw that is a multiple of 128 and <= target; falls
    back to the full dimension only when no 128-multiple divisor exists."""
    target = max(int(target), 128)
    if hw % 128 != 0:
        return hw
    for k in range(min(target, hw) // 128, 0, -1):
        if hw % (128 * k) == 0:
            return 128 * k
    return hw


# ---------------------------------------------------------------------------
# wrapper
# ---------------------------------------------------------------------------

def residual_block3_pallas(x_nchw, params, *, tile_m=1024):
    N, C, H, W = x_nchw.shape
    assert C == 64, "residualBlock3 expects 64 input channels"
    HW = H * W
    M_total = float(N * HW)

    TM = _pick_tile(HW, tile_m)          # pixel tile on the lane axis
    nmt = HW // TM

    x_cm = x_nchw.reshape(N, 64, HW)     # NCHW -> channels-major: free reshape

    # Column index of every pixel (tiny i32 aux input; replaces the old big
    # f32 masks -- for power-of-two W it could be built in-kernel with iota).
    col_idx = (jnp.arange(HW, dtype=jnp.int32) % W).reshape(1, HW)

    # ----------------- pass 1: conv1 (1x1) + BN1 partial stats -----------------
    ws1 = TM * ((64 * 4 + 32 * 2) * 2 + 32 * 12)
    h1, st1 = pl.pallas_call(
        conv1_kernel,
        grid=(N, nmt),
        in_specs=[pl.BlockSpec((1, 64, TM), lambda n, m: (n, 0, m)),
                  pl.BlockSpec((32, 64), lambda n, m: (0, 0))],
        out_specs=[pl.BlockSpec((1, 32, TM), lambda n, m: (n, 0, m)),
                   pl.BlockSpec((1, 32, 2), lambda n, m: (n, 0, 0))],
        out_shape=[jax.ShapeDtypeStruct((N, 32, HW), ACT_DTYPE),
                   jax.ShapeDtypeStruct((N, 32, 2), jnp.float32)],
        compiler_params=_cparams(("parallel", "arbitrary"), ws1),
    )(x_cm, params["w1_cm"])

    s1, t1 = _scale_shift(st1[..., 0].sum(axis=0), st1[..., 1].sum(axis=0),
                          M_total, params["g1"], params["b1"])

    # --------- pass 2: BN1+ReLU + conv2 (3x3) + BN2 partial stats ---------
    MARG = 128 * pl.cdiv(W + 1, 128)     # lane-aligned zero halo, >= W+1
    HWext = HW + 2 * MARG
    ws2 = 32 * HW * 20 + 32 * HWext * 2 + HW * 8
    h2, st2 = pl.pallas_call(
        functools.partial(conv2_kernel, W=W, HW=HW, MARG=MARG),
        grid=(N,),
        in_specs=[pl.BlockSpec((1, 32, HW), lambda n: (n, 0, 0)),
                  pl.BlockSpec((1, HW), lambda n: (0, 0)),
                  pl.BlockSpec((9, 32, 32), lambda n: (0, 0, 0)),
                  pl.BlockSpec((32, 1), lambda n: (0, 0)),
                  pl.BlockSpec((32, 1), lambda n: (0, 0))],
        out_specs=[pl.BlockSpec((1, 32, HW), lambda n: (n, 0, 0)),
                   pl.BlockSpec((1, 32, 2), lambda n: (n, 0, 0))],
        out_shape=[jax.ShapeDtypeStruct((N, 32, HW), ACT_DTYPE),
                   jax.ShapeDtypeStruct((N, 32, 2), jnp.float32)],
        scratch_shapes=[pltpu.VMEM((32, HWext), ACT_DTYPE)],
        compiler_params=_cparams(("parallel",), ws2),
    )(h1, col_idx, params["w2_cm"], s1, t1)

    s2, t2 = _scale_shift(st2[..., 0].sum(axis=0), st2[..., 1].sum(axis=0),
                          M_total, params["g2"], params["b2"])

    # --------- pass 3: BN2+ReLU + conv3 (1x1) -> BN3 partial stats ONLY ---------
    ws3 = TM * (32 * 2 * 2 + 32 * 6 + 64 * 4)
    st3 = pl.pallas_call(
        conv3_stats_kernel,
        grid=(N, nmt),
        in_specs=[pl.BlockSpec((1, 32, TM), lambda n, m: (n, 0, m)),
                  pl.BlockSpec((64, 32), lambda n, m: (0, 0)),
                  pl.BlockSpec((32, 1), lambda n, m: (0, 0)),
                  pl.BlockSpec((32, 1), lambda n, m: (0, 0))],
        out_specs=pl.BlockSpec((1, 64, 2), lambda n, m: (n, 0, 0)),
        out_shape=jax.ShapeDtypeStruct((N, 64, 2), jnp.float32),
        compiler_params=_cparams(("parallel", "arbitrary"), ws3),
    )(h2, params["w3_cm"], s2, t2)

    s3, t3 = _scale_shift(st3[..., 0].sum(axis=0), st3[..., 1].sum(axis=0),
                          M_total, params["g3"], params["b3"])

    # --------- pass 4: recompute conv3 + BN3 (affine) + residual add ---------
    ws4 = TM * ((32 * 2 + 64 * 8) * 2 + 32 * 6 + 64 * 8)
    out_cm = pl.pallas_call(
        conv3_bn3_res_kernel,
        grid=(N, nmt),
        in_specs=[pl.BlockSpec((1, 32, TM), lambda n, m: (n, 0, m)),
                  pl.BlockSpec((1, 64, TM), lambda n, m: (n, 0, m)),
                  pl.BlockSpec((64, 32), lambda n, m: (0, 0)),
                  pl.BlockSpec((32, 1), lambda n, m: (0, 0)),
                  pl.BlockSpec((32, 1), lambda n, m: (0, 0)),
                  pl.BlockSpec((64, 1), lambda n, m: (0, 0)),
                  pl.BlockSpec((64, 1), lambda n, m: (0, 0))],
        out_specs=pl.BlockSpec((1, 64, TM), lambda n, m: (n, 0, m)),
        out_shape=jax.ShapeDtypeStruct((N, 64, HW), jnp.float32),
        compiler_params=_cparams(("parallel", "parallel"), ws4),
    )(h2, x_cm, params["w3_cm"], s2, t2, s3, t3)

    return out_cm.reshape(N, 64, H, W)


# ---------------------------------------------------------------------------
# deterministic parameter init (weights made bf16-exact so kernel & reference
# share identical parameter values)
# ---------------------------------------------------------------------------

def init_params(key):
    ks = jax.random.split(key, 9)

    def q(a):
        return a.astype(jnp.bfloat16).astype(jnp.float32)

    w1_t = q(jax.random.normal(ks[0], (32, 64, 1, 1), jnp.float32) * 0.1)  # OIHW
    w2_t = q(jax.random.normal(ks[1], (32, 32, 3, 3), jnp.float32) * 0.1)
    w3_t = q(jax.random.normal(ks[2], (64, 32, 1, 1), jnp.float32) * 0.1)
    g1 = jax.random.uniform(ks[3], (32,), jnp.float32, 0.5, 1.5)
    b1 = jax.random.normal(ks[4], (32,), jnp.float32) * 0.1
    g2 = jax.random.uniform(ks[5], (32,), jnp.float32, 0.5, 1.5)
    b2 = jax.random.normal(ks[6], (32,), jnp.float32) * 0.1
    g3 = jax.random.uniform(ks[7], (64,), jnp.float32, 0.5, 1.5)
    b3 = jax.random.normal(ks[8], (64,), jnp.float32) * 0.1

    return dict(
        # channels-major matmul weights used inside the kernels (bf16, exact)
        w1_cm=w1_t[:, :, 0, 0].astype(ACT_DTYPE),                       # (32, 64)
        w2_cm=jnp.transpose(w2_t, (2, 3, 0, 1)).reshape(9, 32, 32)
                 .astype(ACT_DTYPE),                                    # (9, 32, 32)
        w3_cm=w3_t[:, :, 0, 0].astype(ACT_DTYPE),                       # (64, 32)
        g1=g1, b1=b1, g2=g2, b2=b2, g3=g3, b3=b3,
        # f32 OIHW copies (identical values) for the reference check
        w1_t=w1_t, w2_t=w2_t, w3_t=w3_t,
    )


# ---------------------------------------------------------------------------
# pure-JAX reference (PyTorch training-mode semantics, NCHW, f32)
# ---------------------------------------------------------------------------

def reference_forward(x, p):
    dn = ("NCHW", "OIHW", "NCHW")
    hp = lax.Precision.HIGHEST

    def bn(h, g, b):
        mu = jnp.mean(h, axis=(0, 2, 3), keepdims=True)
        var = jnp.mean((h - mu) ** 2, axis=(0, 2, 3), keepdims=True)
        return ((h - mu) * lax.rsqrt(var + EPS) * g.reshape(1, -1, 1, 1)
                + b.reshape(1, -1, 1, 1))

    h = lax.conv_general_dilated(x, p["w1_t"], (1, 1), "VALID",
                                 dimension_numbers=dn, precision=hp)
    h = jnp.maximum(bn(h, p["g1"], p["b1"]), 0.0)
    h = lax.conv_general_dilated(h, p["w2_t"], (1, 1), ((1, 1), (1, 1)),
                                 dimension_numbers=dn, precision=hp)
    h = jnp.maximum(bn(h, p["g2"], p["b2"]), 0.0)
    h = lax.conv_general_dilated(h, p["w3_t"], (1, 1), "VALID",
                                 dimension_numbers=dn, precision=hp)
    return bn(h, p["g3"], p["b3"]) + x


# ---------------------------------------------------------------------------
# main
# ---------------------------------------------------------------------------

if __name__ == "__main__":
    key = jax.random.PRNGKey(0)
    k_x, k_p = jax.random.split(key)

    # small shapes: batch=2, channels=64 (fixed by the module), spatial 16x16;
    # tile_m=128 so the pixel-tile grid axis (and the VMEM stats accumulation)
    # is actually exercised (HW=256 -> TM=128, 2 tiles per image).
    x = jax.random.normal(k_x, (2, 64, 16, 16), jnp.float32)
    params = init_params(k_p)

    fwd = jax.jit(functools.partial(residual_block3_pallas, tile_m=128))
    out = jax.block_until_ready(fwd(x, params))

    ref = jax.block_until_ready(reference_forward(x, params))
    assert out.shape == ref.shape == x.shape
    max_err = float(jnp.max(jnp.abs(out - ref)))
    # bf16 activations through 3 convs + 3 training-mode BatchNorms (each
    # renormalizes to ~unit scale * gamma<=1.5) give a few 1e-2 max-abs error;
    # setting ACT_DTYPE = float32 brings this below 1e-3.
    assert max_err < 7.5e-2, f"mismatch vs reference: max abs err = {max_err}"
    print("KERNEL_OK")
</pallas_src>

<mosaic_0001>
module attributes {stable_mosaic.version = 11 : i64} {
  func.func @conv1_kernel(%arg0: i32, %arg1: i32, %arg2: memref<1x64x128xf32, #tpu.memory_space<vmem>>, %arg3: memref<32x64xbf16, #tpu.memory_space<vmem>>, %arg4: memref<1x32x128xbf16, #tpu.memory_space<vmem>>, %arg5: memref<1x32x2xf32, #tpu.memory_space<vmem>>) attributes {dimension_semantics = [#tpu.dimension_semantics<parallel>, #tpu.dimension_semantics<arbitrary>], iteration_bounds = array<i64: 2, 2>, scalar_prefetch = 0 : i64, scratch_operands = 0 : i64, tpu.core_type = #tpu.core_type<tc>, window_params = [{transform_indices = @transform_0, window_bounds = array<i64: 1, 64, 128>}, {pipeline_mode = #tpu.pipeline_mode<synchronous>, transform_indices = @transform_1, window_bounds = array<i64: 32, 64>}, {transform_indices = @transform_2, window_bounds = array<i64: 1, 32, 128>}, {transform_indices = @transform_3, window_bounds = array<i64: 1, 32, 2>}]} {
    %c0_i32 = arith.constant 0 : i32
    %0 = arith.cmpi eq, %arg1, %c0_i32 : i32
    %1 = arith.extui %0 : i1 to i32
    %c0_i32_0 = arith.constant 0 : i32
    %2 = arith.cmpi ne, %1, %c0_i32_0 : i32
    scf.if %2 {
      %cst_21 = arith.constant 0.000000e+00 : f32
      %30 = vector.broadcast %cst_21 : f32 to vector<1x32x2xf32>
      %c0_22 = arith.constant 0 : index
      %c0_23 = arith.constant 0 : index
      %c0_24 = arith.constant 0 : index
      %31 = vector.load %arg5[%c0_22, %c0_23, %c0_24] : memref<1x32x2xf32, #tpu.memory_space<vmem>>, vector<1x32x2xf32>
      tpu.vector_store %arg5[%c0_22, %c0_23, %c0_24], %30 {strides = array<i32>} : memref<1x32x2xf32, #tpu.memory_space<vmem>>, vector<1x32x2xf32>,
    } else {
    }
    %c0 = arith.constant 0 : index
    %c0_1 = arith.constant 0 : index
    %c0_2 = arith.constant 0 : index
    %3 = vector.load %arg2[%c0, %c0_1, %c0_2] : memref<1x64x128xf32, #tpu.memory_space<vmem>>, vector<1x64x128xf32>
    %4 = vector.shape_cast %3 : vector<1x64x128xf32> to vector<64x128xf32>
    %5 = arith.truncf %4 : vector<64x128xf32> to vector<64x128xbf16>
    %c0_3 = arith.constant 0 : index
    %c0_4 = arith.constant 0 : index
    %6 = vector.load %arg3[%c0_3, %c0_4] : memref<32x64xbf16, #tpu.memory_space<vmem>>, vector<32x64xbf16>
    %cst = arith.constant dense<0.000000e+00> : vector<32x128xf32>
    %7 = tpu.matmul %6, %5, %cst {dimension_numbers = #tpu.dot_dimension_numbers<[1], [0], [0], [1], [0, 0, 1, 1], [], []>} : vector<32x64xbf16>, vector<64x128xbf16>, vector<32x128xf32> -> vector<32x128xf32>
    %8 = arith.truncf %7 : vector<32x128xf32> to vector<32x128xbf16>
    %c0_5 = arith.constant 0 : index
    %c0_6 = arith.constant 0 : index
    %c0_7 = arith.constant 0 : index
    %9 = vector.load %arg4[%c0_5, %c0_6, %c0_7] : memref<1x32x128xbf16, #tpu.memory_space<vmem>>, vector<1x32x128xbf16>
    %10 = vector.shape_cast %9 : vector<1x32x128xbf16> to vector<32x128xbf16>
    %11 = vector.shape_cast %8 : vector<32x128xbf16> to vector<1x32x128xbf16>
    tpu.vector_store %arg4[%c0_5, %c0_6, %c0_7], %11 {strides = array<i32>} : memref<1x32x128xbf16, #tpu.memory_space<vmem>>, vector<1x32x128xbf16>,
    %12 = arith.extf %8 : vector<32x128xbf16> to vector<32x128xf32>
    %c0_8 = arith.constant 0 : index
    %c0_9 = arith.constant 0 : index
    %c0_10 = arith.constant 0 : index
    %13 = vector.load %arg5[%c0_8, %c0_9, %c0_10] : memref<1x32x2xf32, #tpu.memory_space<vmem>>, vector<1x32x1xf32>
    %14 = vector.shape_cast %13 : vector<1x32x1xf32> to vector<32x1xf32>
    %cst_11 = arith.constant dense<0.000000e+00> : vector<32xf32>
    %15 = vector.multi_reduction <add>, %12, %cst_11 [1] : vector<32x128xf32> to vector<32xf32>
    %16 = vector.shape_cast %15 : vector<32xf32> to vector<32x1xf32>
    %17 = arith.addf %14, %16 : vector<32x1xf32>
    %c0_12 = arith.constant 0 : index
    %c0_13 = arith.constant 0 : index
    %c0_14 = arith.constant 0 : index
    %18 = vector.load %arg5[%c0_12, %c0_13, %c0_14] : memref<1x32x2xf32, #tpu.memory_space<vmem>>, vector<1x32x1xf32>
    %19 = vector.shape_cast %18 : vector<1x32x1xf32> to vector<32x1xf32>
    %20 = vector.shape_cast %17 : vector<32x1xf32> to vector<1x32x1xf32>
    tpu.vector_store %arg5[%c0_12, %c0_13, %c0_14], %20 {strides = array<i32>} : memref<1x32x2xf32, #tpu.memory_space<vmem>>, vector<1x32x1xf32>,
    %c0_15 = arith.constant 0 : index
    %c0_16 = arith.constant 0 : index
    %c1 = arith.constant 1 : index
    %21 = vector.load %arg5[%c0_15, %c0_16, %c1] : memref<1x32x2xf32, #tpu.memory_space<vmem>>, vector<1x32x1xf32>
    %22 = vector.shape_cast %21 : vector<1x32x1xf32> to vector<32x1xf32>
    %23 = arith.mulf %12, %12 : vector<32x128xf32>
    %cst_17 = arith.constant dense<0.000000e+00> : vector<32xf32>
    %24 = vector.multi_reduction <add>, %23, %cst_17 [1] : vector<32x128xf32> to vector<32xf32>
    %25 = vector.shape_cast %24 : vector<32xf32> to vector<32x1xf32>
    %26 = arith.addf %22, %25 : vector<32x1xf32>
    %c0_18 = arith.constant 0 : index
    %c0_19 = arith.constant 0 : index
    %c1_20 = arith.constant 1 : index
    %27 = vector.load %arg5[%c0_18, %c0_19, %c1_20] : memref<1x32x2xf32, #tpu.memory_space<vmem>>, vector<1x32x1xf32>
    %28 = vector.shape_cast %27 : vector<1x32x1xf32> to vector<32x1xf32>
    %29 = vector.shape_cast %26 : vector<32x1xf32> to vector<1x32x1xf32>
    tpu.vector_store %arg5[%c0_18, %c0_19, %c1_20], %29 {strides = array<i32>} : memref<1x32x2xf32, #tpu.memory_space<vmem>>, vector<1x32x1xf32>,
    return
  }
  func.func @transform_0(%arg0: i32, %arg1: i32) -> (i32, i32, i32) {
    %c0_i32 = arith.constant 0 : i32
    %c0_i32_0 = arith.constant 0 : i32
    return %arg0, %c0_i32, %arg1 : i32, i32, i32
  }
  func.func @transform_1(%arg0: i32, %arg1: i32) -> (i32, i32) {
    %c0_i32 = arith.constant 0 : i32
    %c0_i32_0 = arith.constant 0 : i32
    %c0_i32_1 = arith.constant 0 : i32
    return %c0_i32, %c0_i32_0 : i32, i32
  }
  func.func @transform_2(%arg0: i32, %arg1: i32) -> (i32, i32, i32) {
    %c0_i32 = arith.constant 0 : i32
    %c0_i32_0 = arith.constant 0 : i32
    return %arg0, %c0_i32, %arg1 : i32, i32, i32
  }
  func.func @transform_3(%arg0: i32, %arg1: i32) -> (i32, i32, i32) {
    %c0_i32 = arith.constant 0 : i32
    %c0_i32_0 = arith.constant 0 : i32
    %c0_i32_1 = arith.constant 0 : i32
    return %arg0, %c0_i32, %c0_i32_0 : i32, i32, i32
  }
}

module attributes {stable_mosaic.version = 11 : i64} {
  func.func @conv2_kernel(%arg0: i32, %arg1: memref<1x32x256xbf16, #tpu.memory_space<vmem>>, %arg2: memref<1x256xi32, #tpu.memory_space<vmem>>, %arg3: memref<9x32x32xbf16, #tpu.memory_space<vmem>>, %arg4: memref<32x1xf32, #tpu.memory_space<vmem>>, %arg5: memref<32x1xf32, #tpu.memory_space<vmem>>, %arg6: memref<1x32x256xbf16, #tpu.memory_space<vmem>>, %arg7: memref<1x32x2xf32, #tpu.memory_space<vmem>>, %arg8: memref<32x512xbf16, #tpu.memory_space<vmem>>) attributes {dimension_semantics = [#tpu.dimension_semantics<parallel>], iteration_bounds = array<i64: 2>, scalar_prefetch = 0 : i64, scratch_operands = 1 : i64, tpu.core_type = #tpu.core_type<tc>, window_params = [{transform_indices = @transform_0, window_bounds = array<i64: 1, 32, 256>}, {pipeline_mode = #tpu.pipeline_mode<synchronous>, transform_indices = @transform_1, window_bounds = array<i64: 1, 256>}, {pipeline_mode = #tpu.pipeline_mode<synchronous>, transform_indices = @transform_2, window_bounds = array<i64: 9, 32, 32>}, {pipeline_mode = #tpu.pipeline_mode<synchronous>, transform_indices = @transform_3, window_bounds = array<i64: 32, 1>}, {pipeline_mode = #tpu.pipeline_mode<synchronous>, transform_indices = @transform_4, window_bounds = array<i64: 32, 1>}, {transform_indices = @transform_5, window_bounds = array<i64: 1, 32, 256>}, {transform_indices = @transform_6, window_bounds = array<i64: 1, 32, 2>}]} {
    %cst = arith.constant 0.000000e+00 : bf16
    %0 = vector.broadcast %cst : bf16 to vector<32x128xbf16>
    %c0 = arith.constant 0 : index
    %c0_0 = arith.constant 0 : index
    %1 = vector.load %arg8[%c0, %c0_0] : memref<32x512xbf16, #tpu.memory_space<vmem>>, vector<32x128xbf16>
    tpu.vector_store %arg8[%c0, %c0_0], %0 {strides = array<i32>} : memref<32x512xbf16, #tpu.memory_space<vmem>>, vector<32x128xbf16>,
    %c0_1 = arith.constant 0 : index
    %c384 = arith.constant 384 : index
    %2 = vector.load %arg8[%c0_1, %c384] : memref<32x512xbf16, #tpu.memory_space<vmem>>, vector<32x128xbf16>
    tpu.vector_store %arg8[%c0_1, %c384], %0 {strides = array<i32>} : memref<32x512xbf16, #tpu.memory_space<vmem>>, vector<32x128xbf16>,
    %c0_2 = arith.constant 0 : index
    %c0_3 = arith.constant 0 : index
    %c0_4 = arith.constant 0 : index
    %3 = vector.load %arg1[%c0_2, %c0_3, %c0_4] : memref<1x32x256xbf16, #tpu.memory_space<vmem>>, vector<1x32x256xbf16>
    %4 = vector.shape_cast %3 : vector<1x32x256xbf16> to vector<32x256xbf16>
    %5 = arith.extf %4 : vector<32x256xbf16> to vector<32x256xf32>
    %c0_5 = arith.constant 0 : index
    %c0_6 = arith.constant 0 : index
    %6 = vector.load %arg4[%c0_5, %c0_6] : memref<32x1xf32, #tpu.memory_space<vmem>>, vector<32x1xf32>
    %7 = vector.broadcast %6 : vector<32x1xf32> to vector<32x256xf32>
    %8 = arith.mulf %5, %7 : vector<32x256xf32>
    %c0_7 = arith.constant 0 : index
    %c0_8 = arith.constant 0 : index
    %9 = vector.load %arg5[%c0_7, %c0_8] : memref<32x1xf32, #tpu.memory_space<vmem>>, vector<32x1xf32>
    %10 = vector.broadcast %9 : vector<32x1xf32> to vector<32x256xf32>
    %11 = arith.addf %8, %10 : vector<32x256xf32>
    %cst_9 = arith.constant 0.000000e+00 : f32
    %12 = vector.broadcast %cst_9 : f32 to vector<32x256xf32>
    %13 = arith.maximumf %11, %12 : vector<32x256xf32>
    %14 = arith.truncf %13 : vector<32x256xf32> to vector<32x256xbf16>
    %c0_10 = arith.constant 0 : index
    %c128 = arith.constant 128 : index
    %15 = vector.load %arg8[%c0_10, %c128] : memref<32x512xbf16, #tpu.memory_space<vmem>>, vector<32x256xbf16>
    tpu.vector_store %arg8[%c0_10, %c128], %14 {strides = array<i32>} : memref<32x512xbf16, #tpu.memory_space<vmem>>, vector<32x256xbf16>,
    %c0_11 = arith.constant 0 : index
    %c0_12 = arith.constant 0 : index
    %16 = vector.load %arg2[%c0_11, %c0_12] : memref<1x256xi32, #tpu.memory_space<vmem>>, vector<1x256xi32>
    %c1_i32 = arith.constant 1 : i32
    %17 = vector.broadcast %c1_i32 : i32 to vector<1x256xi32>
    %18 = arith.cmpi sge, %16, %17 : vector<1x256xi32>
    %c14_i32 = arith.constant 14 : i32
    %19 = vector.broadcast %c14_i32 : i32 to vector<1x256xi32>
    %20 = arith.cmpi sle, %16, %19 : vector<1x256xi32>
    %c0_13 = arith.constant 0 : index
    %c111 = arith.constant 111 : index
    %21 = vector.load %arg8[%c0_13, %c111] : memref<32x512xbf16, #tpu.memory_space<vmem>>, vector<32x256xbf16>
    %c0_i32 = arith.constant 0 : i32
    %22 = arith.sitofp %c0_i32 : i32 to bf16
    %23 = vector.shape_cast %18 : vector<1x256xi1> to vector<1x256xi1>
    %24 = vector.broadcast %23 : vector<1x256xi1> to vector<32x256xi1>
    %25 = vector.broadcast %22 : bf16 to vector<32x256xbf16>
    %26 = arith.select %24, %21, %25 : vector<32x256xi1>, vector<32x256xbf16>
    %c0_14 = arith.constant 0 : index
    %c0_15 = arith.constant 0 : index
    %c0_16 = arith.constant 0 : index
    %27 = vector.load %arg3[%c0_14, %c0_15, %c0_16] : memref<9x32x32xbf16, #tpu.memory_space<vmem>>, vector<1x32x32xbf16>
    %28 = vector.shape_cast %27 : vector<1x32x32xbf16> to vector<32x32xbf16>
    %cst_17 = arith.constant dense<0.000000e+00> : vector<32x256xf32>
    %29 = tpu.matmul %28, %26, %cst_17 {dimension_numbers = #tpu.dot_dimension_numbers<[1], [0], [0], [1], [0, 0, 1, 1], [], []>} : vector<32x32xbf16>, vector<32x256xbf16>, vector<32x256xf32> -> vector<32x256xf32>
    %c0_18 = arith.constant 0 : index
    %c112 = arith.constant 112 : index
    %30 = vector.load %arg8[%c0_18, %c112] : memref<32x512xbf16, #tpu.memory_space<vmem>>, vector<32x256xbf16>
    %c1 = arith.constant 1 : index
    %c0_19 = arith.constant 0 : index
    %c0_20 = arith.constant 0 : index
    %31 = vector.load %arg3[%c1, %c0_19, %c0_20] : memref<9x32x32xbf16, #tpu.memory_space<vmem>>, vector<1x32x32xbf16>
    %32 = vector.shape_cast %31 : vector<1x32x32xbf16> to vector<32x32xbf16>
    %cst_21 = arith.constant dense<0.000000e+00> : vector<32x256xf32>
    %33 = tpu.matmul %32, %30, %cst_21 {dimension_numbers = #tpu.dot_dimension_numbers<[1], [0], [0], [1], [0, 0, 1, 1], [], []>} : vector<32x32xbf16>, vector<32x256xbf16>, vector<32x256xf32> -> vector<32x256xf32>
    %34 = arith.addf %29, %33 : vector<32x256xf32>
    %c0_22 = arith.constant 0 : index
    %c113 = arith.constant 113 : index
    %35 = vector.load %arg8[%c0_22, %c113] : memref<32x512xbf16, #tpu.memory_space<vmem>>, vector<32x256xbf16>
    %c0_i32_23 = arith.constant 0 : i32
    %36 = arith.sitofp %c0_i32_23 : i32 to bf16
    %37 = vector.shape_cast %20 : vector<1x256xi1> to vector<1x256xi1>
    %38 = vector.broadcast %37 : vector<1x256xi1> to vector<32x256xi1>
    %39 = vector.broadcast %36 : bf16 to vector<32x256xbf16>
    %40 = arith.select %38, %35, %39 : vector<32x256xi1>, vector<32x256xbf16>
    %c2 = arith.constant 2 : index
    %c0_24 = arith.constant 0 : index
    %c0_25 = arith.constant 0 : index
    %41 = vector.load %arg3[%c2, %c0_24, %c0_25] : memref<9x32x32xbf16, #tpu.memory_space<vmem>>, vector<1x32x32xbf16>
    %42 = vector.shape_cast %41 : vector<1x32x32xbf16> to vector<32x32xbf16>
    %cst_26 = arith.constant dense<0.000000e+00> : vector<32x256xf32>
    %43 = tpu.matmul %42, %40, %cst_26 {dimension_numbers = #tpu.dot_dimension_numbers<[1], [0], [0], [1], [0, 0, 1, 1], [], []>} : vector<32x32xbf16>, vector<32x256xbf16>, vector<32x256xf32> -> vector<32x256xf32>
    %44 = arith.addf %34, %43 : vector<32x256xf32>
    %c0_27 = arith.constant 0 : index
    %c127 = arith.constant 127 : index
    %45 = vector.load %arg8[%c0_27, %c127] : memref<32x512xbf16, #tpu.memory_space<vmem>>, vector<32x256xbf16>
    %c0_i32_28 = arith.constant 0 : i32
    %46 = arith.sitofp %c0_i32_28 : i32 to bf16
    %47 = vector.shape_cast %18 : vector<1x256xi1> to vector<1x256xi1>
    %48 = vector.broadcast %47 : vector<1x256xi1> to vector<32x256xi1>
    %49 = vector.broadcast %46 : bf16 to vector<32x256xbf16>
    %50 = arith.select %48, %45, %49 : vector<32x256xi1>, vector<32x256xbf16>
    %c3 = arith.constant 3 : index
    %c0_29 = arith.constant 0 : index
    %c0_30 = arith.constant 0 : index
    %51 = vector.load %arg3[%c3, %c0_29, %c0_30] : memref<9x32x32xbf16, #tpu.memory_space<vmem>>, vector<1x32x32xbf16>
    %52 = vector.shape_cast %51 : vector<1x32x32xbf16> to vector<32x32xbf16>
    %cst_31 = arith.constant dense<0.000000e+00> : vector<32x256xf32>
    %53 = tpu.matmul %52, %50, %cst_31 {dimension_numbers = #tpu.dot_dimension_numbers<[1], [0], [0], [1], [0, 0, 1, 1], [], []>} : vector<32x32xbf16>, vector<32x256xbf16>, vector<32x256xf32> -> vector<32x256xf32>
    %54 = arith.addf %44, %53 : vector<32x256xf32>
    %c0_32 = arith.constant 0 : index
    %c128_33 = arith.constant 128 : index
    %55 = vector.load %arg8[%c0_32, %c128_33] : memref<32x512xbf16, #tpu.memory_space<vmem>>, vector<32x256xbf16>
    %c4 = arith.constant 4 : index
    %c0_34 = arith.constant 0 : index
    %c0_35 = arith.constant 0 : index
    %56 = vector.load %arg3[%c4, %c0_34, %c0_35] : memref<9x32x32xbf16, #tpu.memory_space<vmem>>, vector<1x32x32xbf16>
    %57 = vector.shape_cast %56 : vector<1x32x32xbf16> to vector<32x32xbf16>
    %cst_36 = arith.constant dense<0.000000e+00> : vector<32x256xf32>
    %58 = tpu.matmul %57, %55, %cst_36 {dimension_numbers = #tpu.dot_dimension_numbers<[1], [0], [0], [1], [0, 0, 1, 1], [], []>} : vector<32x32xbf16>, vector<32x256xbf16>, vector<32x256xf32> -> vector<32x256xf32>
    %59 = arith.addf %54, %58 : vector<32x256xf32>
    %c0_37 = arith.constant 0 : index
    %c129 = arith.constant 129 : index
    %60 = vector.load %arg8[%c0_37, %c129] : memref<32x512xbf16, #tpu.memory_space<vmem>>, vector<32x256xbf16>
    %c0_i32_38 = arith.constant 0 : i32
    %61 = arith.sitofp %c0_i32_38 : i32 to bf16
    %62 = vector.shape_cast %20 : vector<1x256xi1> to vector<1x256xi1>
    %63 = vector.broadcast %62 : vector<1x256xi1> to vector<32x256xi1>
    %64 = vector.broadcast %61 : bf16 to vector<32x256xbf16>
    %65 = arith.select %63, %60, %64 : vector<32x256xi1>, vector<32x256xbf16>
    %c5 = arith.constant 5 : index
    %c0_39 = arith.constant 0 : index
    %c0_40 = arith.constant 0 : index
    %66 = vector.load %arg3[%c5, %c0_39, %c0_40] : memref<9x32x32xbf16, #tpu.memory_space<vmem>>, vector<1x32x32xbf16>
    %67 = vector.shape_cast %66 : vector<1x32x32xbf16> to vector<32x32xbf16>
    %cst_41 = arith.constant dense<0.000000e+00> : vector<32x256xf32>
    %68 = tpu.matmul %67, %65, %cst_41 {dimension_numbers = #tpu.dot_dimension_numbers<[1], [0], [0], [1], [0, 0, 1, 1], [], []>} : vector<32x32xbf16>, vector<32x256xbf16>, vector<32x256xf32> -> vector<32x256xf32>
    %69 = arith.addf %59, %68 : vector<32x256xf32>
    %c0_42 = arith.constant 0 : index
    %c143 = arith.constant 143 : index
    %70 = vector.load %arg8[%c0_42, %c143] : memref<32x512xbf16, #tpu.memory_space<vmem>>, vector<32x256xbf16>
    %c0_i32_43 = arith.constant 0 : i32
    %71 = arith.sitofp %c0_i32_43 : i32 to bf16
    %72 = vector.shape_cast %18 : vector<1x256xi1> to vector<1x256xi1>
    %73 = vector.broadcast %72 : vector<1x256xi1> to vector<32x256xi1>
    %74 = vector.broadcast %71 : bf16 to vector<32x256xbf16>
    %75 = arith.select %73, %70, %74 : vector<32x256xi1>, vector<32x256xbf16>
    %c6 = arith.constant 6 : index
    %c0_44 = arith.constant 0 : index
    %c0_45 = arith.constant 0 : index
    %76 = vector.load %arg3[%c6, %c0_44, %c0_45] : memref<9x32x32xbf16, #tpu.memory_space<vmem>>, vector<1x32x32xbf16>
    %77 = vector.shape_cast %76 : vector<1x32x32xbf16> to vector<32x32xbf16>
    %cst_46 = arith.constant dense<0.000000e+00> : vector<32x256xf32>
    %78 = tpu.matmul %77, %75, %cst_46 {dimension_numbers = #tpu.dot_dimension_numbers<[1], [0], [0], [1], [0, 0, 1, 1], [], []>} : vector<32x32xbf16>, vector<32x256xbf16>, vector<32x256xf32> -> vector<32x256xf32>
    %79 = arith.addf %69, %78 : vector<32x256xf32>
    %c0_47 = arith.constant 0 : index
    %c144 = arith.constant 144 : index
    %80 = vector.load %arg8[%c0_47, %c144] : memref<32x512xbf16, #tpu.memory_space<vmem>>, vector<32x256xbf16>
    %c7 = arith.constant 7 : index
    %c0_48 = arith.constant 0 : index
    %c0_49 = arith.constant 0 : index
    %81 = vector.load %arg3[%c7, %c0_48, %c0_49] : memref<9x32x32xbf16, #tpu.memory_space<vmem>>, vector<1x32x32xbf16>
    %82 = vector.shape_cast %81 : vector<1x32x32xbf16> to vector<32x32xbf16>
    %cst_50 = arith.constant dense<0.000000e+00> : vector<32x256xf32>
    %83 = tpu.matmul %82, %80, %cst_50 {dimension_numbers = #tpu.dot_dimension_numbers<[1], [0], [0], [1], [0, 0, 1, 1], [], []>} : vector<32x32xbf16>, vector<32x256xbf16>, vector<32x256xf32> -> vector<32x256xf32>
    %84 = arith.addf %79, %83 : vector<32x256xf32>
    %c0_51 = arith.constant 0 : index
    %c145 = arith.constant 145 : index
    %85 = vector.load %arg8[%c0_51, %c145] : memref<32x512xbf16, #tpu.memory_space<vmem>>, vector<32x256xbf16>
    %c0_i32_52 = arith.constant 0 : i32
    %86 = arith.sitofp %c0_i32_52 : i32 to bf16
    %87 = vector.shape_cast %20 : vector<1x256xi1> to vector<1x256xi1>
    %88 = vector.broadcast %87 : vector<1x256xi1> to vector<32x256xi1>
    %89 = vector.broadcast %86 : bf16 to vector<32x256xbf16>
    %90 = arith.select %88, %85, %89 : vector<32x256xi1>, vector<32x256xbf16>
    %c8 = arith.constant 8 : index
    %c0_53 = arith.constant 0 : index
    %c0_54 = arith.constant 0 : index
    %91 = vector.load %arg3[%c8, %c0_53, %c0_54] : memref<9x32x32xbf16, #tpu.memory_space<vmem>>, vector<1x32x32xbf16>
    %92 = vector.shape_cast %91 : vector<1x32x32xbf16> to vector<32x32xbf16>
    %cst_55 = arith.constant dense<0.000000e+00> : vector<32x256xf32>
    %93 = tpu.matmul %92, %90, %cst_55 {dimension_numbers = #tpu.dot_dimension_numbers<[1], [0], [0], [1], [0, 0, 1, 1], [], []>} : vector<32x32xbf16>, vector<32x256xbf16>, vector<32x256xf32> -> vector<32x256xf32>
    %94 = arith.addf %84, %93 : vector<32x256xf32>
    %95 = arith.truncf %94 : vector<32x256xf32> to vector<32x256xbf16>
    %c0_56 = arith.constant 0 : index
    %c0_57 = arith.constant 0 : index
    %c0_58 = arith.constant 0 : index
    %96 = vector.load %arg6[%c0_56, %c0_57, %c0_58] : memref<1x32x256xbf16, #tpu.memory_space<vmem>>, vector<1x32x256xbf16>
    %97 = vector.shape_cast %96 : vector<1x32x256xbf16> to vector<32x256xbf16>
    %98 = vector.shape_cast %95 : vector<32x256xbf16> to vector<1x32x256xbf16>
    tpu.vector_store %arg6[%c0_56, %c0_57, %c0_58], %98 {strides = array<i32>} : memref<1x32x256xbf16, #tpu.memory_space<vmem>>, vector<1x32x256xbf16>,
    %99 = arith.extf %95 : vector<32x256xbf16> to vector<32x256xf32>
    %cst_59 = arith.constant dense<0.000000e+00> : vector<32xf32>
    %100 = vector.multi_reduction <add>, %99, %cst_59 [1] : vector<32x256xf32> to vector<32xf32>
    %101 = vector.shape_cast %100 : vector<32xf32> to vector<32x1xf32>
    %c0_60 = arith.constant 0 : index
    %c0_61 = arith.constant 0 : index
    %c0_62 = arith.constant 0 : index
    %102 = vector.load %arg7[%c0_60, %c0_61, %c0_62] : memref<1x32x2xf32, #tpu.memory_space<vmem>>, vector<1x32x1xf32>
    %103 = vector.shape_cast %102 : vector<1x32x1xf32> to vector<32x1xf32>
    %104 = vector.shape_cast %101 : vector<32x1xf32> to vector<1x32x1xf32>
    tpu.vector_store %arg7[%c0_60, %c0_61, %c0_62], %104 {strides = array<i32>} : memref<1x32x2xf32, #tpu.memory_space<vmem>>, vector<1x32x1xf32>,
    %105 = arith.mulf %99, %99 : vector<32x256xf32>
    %cst_63 = arith.constant dense<0.000000e+00> : vector<32xf32>
    %106 = vector.multi_reduction <add>, %105, %cst_63 [1] : vector<32x256xf32> to vector<32xf32>
    %107 = vector.shape_cast %106 : vector<32xf32> to vector<32x1xf32>
    %c0_64 = arith.constant 0 : index
    %c0_65 = arith.constant 0 : index
    %c1_66 = arith.constant 1 : index
    %108 = vector.load %arg7[%c0_64, %c0_65, %c1_66] : memref<1x32x2xf32, #tpu.memory_space<vmem>>, vector<1x32x1xf32>
    %109 = vector.shape_cast %108 : vector<1x32x1xf32> to vector<32x1xf32>
    %110 = vector.shape_cast %107 : vector<32x1xf32> to vector<1x32x1xf32>
    tpu.vector_store %arg7[%c0_64, %c0_65, %c1_66], %110 {strides = array<i32>} : memref<1x32x2xf32, #tpu.memory_space<vmem>>, vector<1x32x1xf32>,
    return
  }
  func.func @transform_0(%arg0: i32) -> (i32, i32, i32) {
    %c0_i32 = arith.constant 0 : i32
    %c0_i32_0 = arith.constant 0 : i32
    %c0_i32_1 = arith.constant 0 : i32
    return %arg0, %c0_i32, %c0_i32_0 : i32, i32, i32
  }
  func.func @transform_1(%arg0: i32) -> (i32, i32) {
    %c0_i32 = arith.constant 0 : i32
    %c0_i32_0 = arith.constant 0 : i32
    %c0_i32_1 = arith.constant 0 : i32
    return %c0_i32, %c0_i32_0 : i32, i32
  }
  func.func @transform_2(%arg0: i32) -> (i32, i32, i32) {
    %c0_i32 = arith.constant 0 : i32
    %c0_i32_0 = arith.constant 0 : i32
    %c0_i32_1 = arith.constant 0 : i32
    %c0_i32_2 = arith.constant 0 : i32
    return %c0_i32, %c0_i32_0, %c0_i32_1 : i32, i32, i32
  }
  func.func @transform_3(%arg0: i32) -> (i32, i32) {
    %c0_i32 = arith.constant 0 : i32
    %c0_i32_0 = arith.constant 0 : i32
    %c0_i32_1 = arith.constant 0 : i32
    return %c0_i32, %c0_i32_0 : i32, i32
  }
  func.func @transform_4(%arg0: i32) -> (i32, i32) {
    %c0_i32 = arith.constant 0 : i32
    %c0_i32_0 = arith.constant 0 : i32
    %c0_i32_1 = arith.constant 0 : i32
    return %c0_i32, %c0_i32_0 : i32, i32
  }
  func.func @transform_5(%arg0: i32) -> (i32, i32, i32) {
    %c0_i32 = arith.constant 0 : i32
    %c0_i32_0 = arith.constant 0 : i32
    %c0_i32_1 = arith.constant 0 : i32
    return %arg0, %c0_i32, %c0_i32_0 : i32, i32, i32
  }
  func.func @transform_6(%arg0: i32) -> (i32, i32, i32) {
    %c0_i32 = arith.constant 0 : i32
    %c0_i32_0 = arith.constant 0 : i32
    %c0_i32_1 = arith.constant 0 : i32
    return %arg0, %c0_i32, %c0_i32_0 : i32, i32, i32
  }
}

module attributes {stable_mosaic.version = 11 : i64} {
  func.func @conv3_stats_kernel(%arg0: i32, %arg1: i32, %arg2: memref<1x32x128xbf16, #tpu.memory_space<vmem>>, %arg3: memref<64x32xbf16, #tpu.memory_space<vmem>>, %arg4: memref<32x1xf32, #tpu.memory_space<vmem>>, %arg5: memref<32x1xf32, #tpu.memory_space<vmem>>, %arg6: memref<1x64x2xf32, #tpu.memory_space<vmem>>) attributes {dimension_semantics = [#tpu.dimension_semantics<parallel>, #tpu.dimension_semantics<arbitrary>], iteration_bounds = array<i64: 2, 2>, scalar_prefetch = 0 : i64, scratch_operands = 0 : i64, tpu.core_type = #tpu.core_type<tc>, window_params = [{transform_indices = @transform_0, window_bounds = array<i64: 1, 32, 128>}, {pipeline_mode = #tpu.pipeline_mode<synchronous>, transform_indices = @transform_1, window_bounds = array<i64: 64, 32>}, {pipeline_mode = #tpu.pipeline_mode<synchronous>, transform_indices = @transform_2, window_bounds = array<i64: 32, 1>}, {pipeline_mode = #tpu.pipeline_mode<synchronous>, transform_indices = @transform_3, window_bounds = array<i64: 32, 1>}, {transform_indices = @transform_4, window_bounds = array<i64: 1, 64, 2>}]} {
    %c0_i32 = arith.constant 0 : i32
    %0 = arith.cmpi eq, %arg1, %c0_i32 : i32
    %1 = arith.extui %0 : i1 to i32
    %c0_i32_0 = arith.constant 0 : i32
    %2 = arith.cmpi ne, %1, %c0_i32_0 : i32
    scf.if %2 {
      %cst_23 = arith.constant 0.000000e+00 : f32
      %34 = vector.broadcast %cst_23 : f32 to vector<1x64x2xf32>
      %c0_24 = arith.constant 0 : index
      %c0_25 = arith.constant 0 : index
      %c0_26 = arith.constant 0 : index
      %35 = vector.load %arg6[%c0_24, %c0_25, %c0_26] : memref<1x64x2xf32, #tpu.memory_space<vmem>>, vector<1x64x2xf32>
      tpu.vector_store %arg6[%c0_24, %c0_25, %c0_26], %34 {strides = array<i32>} : memref<1x64x2xf32, #tpu.memory_space<vmem>>, vector<1x64x2xf32>,
    } else {
    }
    %c0 = arith.constant 0 : index
    %c0_1 = arith.constant 0 : index
    %c0_2 = arith.constant 0 : index
    %3 = vector.load %arg2[%c0, %c0_1, %c0_2] : memref<1x32x128xbf16, #tpu.memory_space<vmem>>, vector<1x32x128xbf16>
    %4 = vector.shape_cast %3 : vector<1x32x128xbf16> to vector<32x128xbf16>
    %5 = arith.extf %4 : vector<32x128xbf16> to vector<32x128xf32>
    %c0_3 = arith.constant 0 : index
    %c0_4 = arith.constant 0 : index
    %6 = vector.load %arg4[%c0_3, %c0_4] : memref<32x1xf32, #tpu.memory_space<vmem>>, vector<32x1xf32>
    %7 = vector.broadcast %6 : vector<32x1xf32> to vector<32x128xf32>
    %8 = arith.mulf %5, %7 : vector<32x128xf32>
    %c0_5 = arith.constant 0 : index
    %c0_6 = arith.constant 0 : index
    %9 = vector.load %arg5[%c0_5, %c0_6] : memref<32x1xf32, #tpu.memory_space<vmem>>, vector<32x1xf32>
    %10 = vector.broadcast %9 : vector<32x1xf32> to vector<32x128xf32>
    %11 = arith.addf %8, %10 : vector<32x128xf32>
    %cst = arith.constant 0.000000e+00 : f32
    %12 = vector.broadcast %cst : f32 to vector<32x128xf32>
    %13 = arith.maximumf %11, %12 : vector<32x128xf32>
    %14 = arith.truncf %13 : vector<32x128xf32> to vector<32x128xbf16>
    %c0_7 = arith.constant 0 : index
    %c0_8 = arith.constant 0 : index
    %15 = vector.load %arg3[%c0_7, %c0_8] : memref<64x32xbf16, #tpu.memory_space<vmem>>, vector<64x32xbf16>
    %cst_9 = arith.constant dense<0.000000e+00> : vector<64x128xf32>
    %16 = tpu.matmul %15, %14, %cst_9 {dimension_numbers = #tpu.dot_dimension_numbers<[1], [0], [0], [1], [0, 0, 1, 1], [], []>} : vector<64x32xbf16>, vector<32x128xbf16>, vector<64x128xf32> -> vector<64x128xf32>
    %c0_10 = arith.constant 0 : index
    %c0_11 = arith.constant 0 : index
    %c0_12 = arith.constant 0 : index
    %17 = vector.load %arg6[%c0_10, %c0_11, %c0_12] : memref<1x64x2xf32, #tpu.memory_space<vmem>>, vector<1x64x1xf32>
    %18 = vector.shape_cast %17 : vector<1x64x1xf32> to vector<64x1xf32>
    %cst_13 = arith.constant dense<0.000000e+00> : vector<64xf32>
    %19 = vector.multi_reduction <add>, %16, %cst_13 [1] : vector<64x128xf32> to vector<64xf32>
    %20 = vector.shape_cast %19 : vector<64xf32> to vector<64x1xf32>
    %21 = arith.addf %18, %20 : vector<64x1xf32>
    %c0_14 = arith.constant 0 : index
    %c0_15 = arith.constant 0 : index
    %c0_16 = arith.constant 0 : index
    %22 = vector.load %arg6[%c0_14, %c0_15, %c0_16] : memref<1x64x2xf32, #tpu.memory_space<vmem>>, vector<1x64x1xf32>
    %23 = vector.shape_cast %22 : vector<1x64x1xf32> to vector<64x1xf32>
    %24 = vector.shape_cast %21 : vector<64x1xf32> to vector<1x64x1xf32>
    tpu.vector_store %arg6[%c0_14, %c0_15, %c0_16], %24 {strides = array<i32>} : memref<1x64x2xf32, #tpu.memory_space<vmem>>, vector<1x64x1xf32>,
    %c0_17 = arith.constant 0 : index
    %c0_18 = arith.constant 0 : index
    %c1 = arith.constant 1 : index
    %25 = vector.load %arg6[%c0_17, %c0_18, %c1] : memref<1x64x2xf32, #tpu.memory_space<vmem>>, vector<1x64x1xf32>
    %26 = vector.shape_cast %25 : vector<1x64x1xf32> to vector<64x1xf32>
    %27 = arith.mulf %16, %16 : vector<64x128xf32>
    %cst_19 = arith.constant dense<0.000000e+00> : vector<64xf32>
    %28 = vector.multi_reduction <add>, %27, %cst_19 [1] : vector<64x128xf32> to vector<64xf32>
    %29 = vector.shape_cast %28 : vector<64xf32> to vector<64x1xf32>
    %30 = arith.addf %26, %29 : vector<64x1xf32>
    %c0_20 = arith.constant 0 : index
    %c0_21 = arith.constant 0 : index
    %c1_22 = arith.constant 1 : index
    %31 = vector.load %arg6[%c0_20, %c0_21, %c1_22] : memref<1x64x2xf32, #tpu.memory_space<vmem>>, vector<1x64x1xf32>
    %32 = vector.shape_cast %31 : vector<1x64x1xf32> to vector<64x1xf32>
    %33 = vector.shape_cast %30 : vector<64x1xf32> to vector<1x64x1xf32>
    tpu.vector_store %arg6[%c0_20, %c0_21, %c1_22], %33 {strides = array<i32>} : memref<1x64x2xf32, #tpu.memory_space<vmem>>, vector<1x64x1xf32>,
    return
  }
  func.func @transform_0(%arg0: i32, %arg1: i32) -> (i32, i32, i32) {
    %c0_i32 = arith.constant 0 : i32
    %c0_i32_0 = arith.constant 0 : i32
    return %arg0, %c0_i32, %arg1 : i32, i32, i32
  }
  func.func @transform_1(%arg0: i32, %arg1: i32) -> (i32, i32) {
    %c0_i32 = arith.constant 0 : i32
    %c0_i32_0 = arith.constant 0 : i32
    %c0_i32_1 = arith.constant 0 : i32
    return %c0_i32, %c0_i32_0 : i32, i32
  }
  func.func @transform_2(%arg0: i32, %arg1: i32) -> (i32, i32) {
    %c0_i32 = arith.constant 0 : i32
    %c0_i32_0 = arith.constant 0 : i32
    %c0_i32_1 = arith.constant 0 : i32
    return %c0_i32, %c0_i32_0 : i32, i32
  }
  func.func @transform_3(%arg0: i32, %arg1: i32) -> (i32, i32) {
    %c0_i32 = arith.constant 0 : i32
    %c0_i32_0 = arith.constant 0 : i32
    %c0_i32_1 = arith.constant 0 : i32
    return %c0_i32, %c0_i32_0 : i32, i32
  }
  func.func @transform_4(%arg0: i32, %arg1: i32) -> (i32, i32, i32) {
    %c0_i32 = arith.constant 0 : i32
    %c0_i32_0 = arith.constant 0 : i32
    %c0_i32_1 = arith.constant 0 : i32
    return %arg0, %c0_i32, %c0_i32_0 : i32, i32, i32
  }
}

module attributes {stable_mosaic.version = 11 : i64} {
  func.func @conv3_bn3_res_kernel(%arg0: i32, %arg1: i32, %arg2: memref<1x32x128xbf16, #tpu.memory_space<vmem>>, %arg3: memref<1x64x128xf32, #tpu.memory_space<vmem>>, %arg4: memref<64x32xbf16, #tpu.memory_space<vmem>>, %arg5: memref<32x1xf32, #tpu.memory_space<vmem>>, %arg6: memref<32x1xf32, #tpu.memory_space<vmem>>, %arg7: memref<64x1xf32, #tpu.memory_space<vmem>>, %arg8: memref<64x1xf32, #tpu.memory_space<vmem>>, %arg9: memref<1x64x128xf32, #tpu.memory_space<vmem>>) attributes {dimension_semantics = [#tpu.dimension_semantics<parallel>, #tpu.dimension_semantics<parallel>], iteration_bounds = array<i64: 2, 2>, scalar_prefetch = 0 : i64, scratch_operands = 0 : i64, tpu.core_type = #tpu.core_type<tc>, window_params = [{transform_indices = @transform_0, window_bounds = array<i64: 1, 32, 128>}, {transform_indices = @transform_1, window_bounds = array<i64: 1, 64, 128>}, {pipeline_mode = #tpu.pipeline_mode<synchronous>, transform_indices = @transform_2, window_bounds = array<i64: 64, 32>}, {pipeline_mode = #tpu.pipeline_mode<synchronous>, transform_indices = @transform_3, window_bounds = array<i64: 32, 1>}, {pipeline_mode = #tpu.pipeline_mode<synchronous>, transform_indices = @transform_4, window_bounds = array<i64: 32, 1>}, {pipeline_mode = #tpu.pipeline_mode<synchronous>, transform_indices = @transform_5, window_bounds = array<i64: 64, 1>}, {pipeline_mode = #tpu.pipeline_mode<synchronous>, transform_indices = @transform_6, window_bounds = array<i64: 64, 1>}, {transform_indices = @transform_7, window_bounds = array<i64: 1, 64, 128>}]} {
    %c0 = arith.constant 0 : index
    %c0_0 = arith.constant 0 : index
    %c0_1 = arith.constant 0 : index
    %0 = vector.load %arg2[%c0, %c0_0, %c0_1] : memref<1x32x128xbf16, #tpu.memory_space<vmem>>, vector<1x32x128xbf16>
    %1 = vector.shape_cast %0 : vector<1x32x128xbf16> to vector<32x128xbf16>
    %2 = arith.extf %1 : vector<32x128xbf16> to vector<32x128xf32>
    %c0_2 = arith.constant 0 : index
    %c0_3 = arith.constant 0 : index
    %3 = vector.load %arg5[%c0_2, %c0_3] : memref<32x1xf32, #tpu.memory_space<vmem>>, vector<32x1xf32>
    %4 = vector.broadcast %3 : vector<32x1xf32> to vector<32x128xf32>
    %5 = arith.mulf %2, %4 : vector<32x128xf32>
    %c0_4 = arith.constant 0 : index
    %c0_5 = arith.constant 0 : index
    %6 = vector.load %arg6[%c0_4, %c0_5] : memref<32x1xf32, #tpu.memory_space<vmem>>, vector<32x1xf32>
    %7 = vector.broadcast %6 : vector<32x1xf32> to vector<32x128xf32>
    %8 = arith.addf %5, %7 : vector<32x128xf32>
    %cst = arith.constant 0.000000e+00 : f32
    %9 = vector.broadcast %cst : f32 to vector<32x128xf32>
    %10 = arith.maximumf %8, %9 : vector<32x128xf32>
    %11 = arith.truncf %10 : vector<32x128xf32> to vector<32x128xbf16>
    %c0_6 = arith.constant 0 : index
    %c0_7 = arith.constant 0 : index
    %12 = vector.load %arg4[%c0_6, %c0_7] : memref<64x32xbf16, #tpu.memory_space<vmem>>, vector<64x32xbf16>
    %cst_8 = arith.constant dense<0.000000e+00> : vector<64x128xf32>
    %13 = tpu.matmul %12, %11, %cst_8 {dimension_numbers = #tpu.dot_dimension_numbers<[1], [0], [0], [1], [0, 0, 1, 1], [], []>} : vector<64x32xbf16>, vector<32x128xbf16>, vector<64x128xf32> -> vector<64x128xf32>
    %c0_9 = arith.constant 0 : index
    %c0_10 = arith.constant 0 : index
    %14 = vector.load %arg7[%c0_9, %c0_10] : memref<64x1xf32, #tpu.memory_space<vmem>>, vector<64x1xf32>
    %15 = vector.broadcast %14 : vector<64x1xf32> to vector<64x128xf32>
    %16 = arith.mulf %13, %15 : vector<64x128xf32>
    %c0_11 = arith.constant 0 : index
    %c0_12 = arith.constant 0 : index
    %17 = vector.load %arg8[%c0_11, %c0_12] : memref<64x1xf32, #tpu.memory_space<vmem>>, vector<64x1xf32>
    %18 = vector.broadcast %17 : vector<64x1xf32> to vector<64x128xf32>
    %19 = arith.addf %16, %18 : vector<64x128xf32>
    %c0_13 = arith.constant 0 : index
    %c0_14 = arith.constant 0 : index
    %c0_15 = arith.constant 0 : index
    %20 = vector.load %arg3[%c0_13, %c0_14, %c0_15] : memref<1x64x128xf32, #tpu.memory_space<vmem>>, vector<1x64x128xf32>
    %21 = vector.shape_cast %20 : vector<1x64x128xf32> to vector<64x128xf32>
    %22 = arith.addf %19, %21 : vector<64x128xf32>
    %c0_16 = arith.constant 0 : index
    %c0_17 = arith.constant 0 : index
    %c0_18 = arith.constant 0 : index
    %23 = vector.load %arg9[%c0_16, %c0_17, %c0_18] : memref<1x64x128xf32, #tpu.memory_space<vmem>>, vector<1x64x128xf32>
    %24 = vector.shape_cast %23 : vector<1x64x128xf32> to vector<64x128xf32>
    %25 = vector.shape_cast %22 : vector<64x128xf32> to vector<1x64x128xf32>
    tpu.vector_store %arg9[%c0_16, %c0_17, %c0_18], %25 {strides = array<i32>} : memref<1x64x128xf32, #tpu.memory_space<vmem>>, vector<1x64x128xf32>,
    return
  }
  func.func @transform_0(%arg0: i32, %arg1: i32) -> (i32, i32, i32) {
    %c0_i32 = arith.constant 0 : i32
    %c0_i32_0 = arith.constant 0 : i32
    return %arg0, %c0_i32, %arg1 : i32, i32, i32
  }
  func.func @transform_1(%arg0: i32, %arg1: i32) -> (i32, i32, i32) {
    %c0_i32 = arith.constant 0 : i32
    %c0_i32_0 = arith.constant 0 : i32
    return %arg0, %c0_i32, %arg1 : i32, i32, i32
  }
  func.func @transform_2(%arg0: i32, %arg1: i32) -> (i32, i32) {
    %c0_i32 = arith.constant 0 : i32
    %c0_i32_0 = arith.constant 0 : i32
    %c0_i32_1 = arith.constant 0 : i32
    return %c0_i32, %c0_i32_0 : i32, i32
  }
  func.func @transform_3(%arg0: i32, %arg1: i32) -> (i32, i32) {
    %c0_i32 = arith.constant 0 : i32
    %c0_i32_0 = arith.constant 0 : i32
    %c0_i32_1 = arith.constant 0 : i32
    return %c0_i32, %c0_i32_0 : i32, i32
  }
  func.func @transform_4(%arg0: i32, %arg1: i32) -> (i32, i32) {
    %c0_i32 = arith.constant 0 : i32
    %c0_i32_0 = arith.constant 0 : i32
    %c0_i32_1 = arith.constant 0 : i32
    return %c0_i32, %c0_i32_0 : i32, i32
  }
  func.func @transform_5(%arg0: i32, %arg1: i32) -> (i32, i32) {
    %c0_i32 = arith.constant 0 : i32
    %c0_i32_0 = arith.constant 0 : i32
    %c0_i32_1 = arith.constant 0 : i32
    return %c0_i32, %c0_i32_0 : i32, i32
  }
  func.func @transform_6(%arg0: i32, %arg1: i32) -> (i32, i32) {
    %c0_i32 = arith.constant 0 : i32
    %c0_i32_0 = arith.constant 0 : i32
    %c0_i32_1 = arith.constant 0 : i32
    return %c0_i32, %c0_i32_0 : i32, i32
  }
  func.func @transform_7(%arg0: i32, %arg1: i32) -> (i32, i32, i32) {
    %c0_i32 = arith.constant 0 : i32
    %c0_i32_0 = arith.constant 0 : i32
    return %arg0, %c0_i32, %arg1 : i32, i32, i32
  }
}

</mosaic_0001>

<bundles_post_ra>
// kernel: residual_block3_pallas.4
= control target key start
LH: loop header
LB: loop body
LE: loop exit
PB: predicated region body
PF: predicated region fallthrough
CT: control target
= control target key end

     0   :  { %s783_s12 = smov 0   ;;  %s785_s13 = smov 0   ;;  %s923_s0 = inlined_call_operand.vmem [shape: f32[2,64,256], index: 0, kind: input, shape index: {}]   ;;  %s924_s1 = inlined_call_operand.vmem [shape: bf16[32,64], index: 1, kind: input, shape index: {}]   ;;  %s925_s2 = inlined_call_operand.vmem [shape: bf16[2,32,256], index: 2, kind: output, shape index: {0}]   ;;  %s926_s3 = inlined_call_operand.vmem [shape: f32[2,32,2], index: 3, kind: output, shape index: {1}]  }
   0x1   :  { %s787_s14 = smov 0   ;;  %s789_s15 = smov 0  }
   0x2   :  { %s791_s16 = smov 0   ;;  %s793_s17 = smov 0  }
   0x3   :  { %s795_s18 = smov 0  }
   0x4 LB: > { %s23_s19 = sadd.s32 1, %s752_s16  ;;  %s26_s20 = sadd.s32 1, %s756_s17  ;;  %s760_s18 = sphi %s795_s18, %s14_s18   ;;  %s756_s17 = sphi %s793_s17, %s933_s17   ;;  %s752_s16 = sphi %s791_s16, %s932_s16   ;;  %s748_s15 = sphi %s789_s15, %s931_s15   ;;  %s744_s14 = sphi %s787_s14, %s930_s14   ;;  %s740_s13 = sphi %s785_s13, %s929_s13   ;;  %s736_s12 = sphi %s783_s12, %s928_s12  }
   0x5   : > { %p24_p0 = scmp.ge.s32.totalorder %s23_s19, 2  ;;  %s587_s21 = sadd.s32 4294967295, %s760_s18  }
   0x6   : > { %p42_p1 = scmp.ne.s32.totalorder %s740_s13, %s736_s12  ;;  %p43_p2 = scmp.eq.s32.totalorder %s760_s18, 0 }
   0x7   : > { %s935_s19 = smov (%p24_p0, %s23_s19), 0  ;;  %s937_s20 = smov (!%p24_p0, %s26_s20), %s756_s17 }
   0x8   : > { %p28_p3 = scmp.ge.s32.totalorder %s937_s20, 2  ;;  %p95_p4 = scmp.eq.s32.totalorder %s587_s21, 3 }
   0x9   : > { %s31_s22 = ssub.s32 %s752_s16, %s935_s19  ;;  %p44_p5 = por %p43_p2, %p42_p1 }
   0xa   : > { %s939_s20 = smov (%p28_p3, %s937_s20), 0  ;;  %p831_p6 = por %p95_p4, %p42_p1 }
   0xb   : > { %s30_s24 = ssub.s32 %s756_s17, %s939_s20  ;;  %s35_s26 = sadd.s32 1, %s740_s13 }
   0xc   : > { %s32_s25 = sor.u32 %s31_s22, %s30_s24  ;;  %p590_p8 = scmp.ge.s32.totalorder %s760_s18, 4 }
   0xd   : > { %p33_p7 = scmp.eq.s32.totalorder %s32_s25, 0 }
   0xe   : > { %146 = sbr.rel (%p590_p8) target bundleno = 31 (0x1f), region = 20 }
   0xf   : > { %s839_s27 = scalar_select %p33_p7, %s740_s13, %s35_s26  }
  0x15   : > { %149 = sbr.rel (!%p44_p5) target bundleno = 31 (0x1f), region = 24  ;;  %s151_s28 = sand.u32 (%p44_p5), 1, %s740_s13  }
  0x16   : > { %s592_s29 = sshll.u32 (%p44_p5), %s756_s17, 4  ;;  %s591_s30 = sshll.u32 (%p44_p5), %s151_s28, 6 }
  0x17   : > { %s155_s4 = sadd.s32 (%p44_p5), %s752_s16, %s592_s29  ;;  %s153_s9 = scalar_lea.vmem (%p44_p5), [#allocation2], %s591_s30 }
  0x18   : > { %s593_s5 = sshll.u32 (%p44_p5), %s155_s4, 3 }
  0x19   : > { %s157_s8 = scalar_lea.vmem (%p44_p5), %s923_s0, %s593_s5 }
  0x1a   : > { %v199_v0 = vld [vmem:[%s157_s8] sm:$0xff] (%p44_p5)  ;;  %v201_v1 = vld [vmem:[%s157_s8 + $0x10] sm:$0xff] (%p44_p5) }
  0x1b   : > { %v203_v2 = vld [vmem:[%s157_s8 + $0x20] sm:$0xff] (%p44_p5)  ;;  %200 = vst [vmem:[%s153_s9] sm:$0xff] (%p44_p5), %v199_v0  ;;  %202 = vst [vmem:[%s153_s9 + $0x8] sm:$0xff] (%p44_p5), %v201_v1  ;;  %v205_v3 = vld [vmem:[%s157_s8 + $0x30] sm:$0xff] (%p44_p5) }
  0x1c   : > { %204 = vst [vmem:[%s153_s9 + $0x10] sm:$0xff] %v203_v2  ;;  %v207_v4 = vld [vmem:[%s157_s8 + $0x40] sm:$0xff]  ;;  %v209_v5 = vld [vmem:[%s157_s8 + $0x50] sm:$0xff]  ;;  %206 = vst [vmem:[%s153_s9 + $0x18] sm:$0xff] %v205_v3 }
  0x1d   : > { %208 = vst [vmem:[%s153_s9 + $0x20] sm:$0xff] %v207_v4  ;;  %210 = vst [vmem:[%s153_s9 + $0x28] sm:$0xff] %v209_v5  ;;  %v211_v6 = vld [vmem:[%s157_s8 + $0x60] sm:$0xff]  ;;  %v213_v7 = vld [vmem:[%s157_s8 + $0x70] sm:$0xff] }
  0x1e   : > { %212 = vst [vmem:[%s153_s9 + $0x30] sm:$0xff] %v211_v6  ;;  %214 = vst [vmem:[%s153_s9 + $0x38] sm:$0xff] %v213_v7 }
  0x1f PF: > { %p594_p9 = scmp.ge.s32.totalorder %s760_s18, 1  ;;  %p219_p10 = scmp.lt.s32.totalorder %s760_s18, 5 }
  0x21   : > { %p220_p11 = pnand %p594_p9, %p219_p10 }
  0x22   : > { %s226_s10 = sand.u32 (!%p220_p11), 1, %s736_s12   ;;  %p253_p12 = scmp.lt.s32.totalorder (!%p220_p11), %s748_s15, 1 }
  0x23   : > { %223 = sbr.rel (%p220_p11) target bundleno = 447 (0x1bf), region = 62  ;;  %s595_s11 = sshll.u32 (!%p220_p11), %s226_s10, 6 }
  0x24   : > { %s596_s21 = sshll.u32 (!%p220_p11), %s226_s10, 4  ;;  %s228_s29 = scalar_lea.vmem (!%p220_p11), [#allocation2], %s595_s11 }
  0x25   : > { %s858_s30 = scalar_lea.vmem (!%p220_p11), [#allocation3], %s596_s21  ;;  %p599_p13 = scmp.ne.s32.totalorder (!%p220_p11), %s744_s14, 0 }
  0x2a   : > { %s254_s22 = scalar_select %p253_p12, %s748_s15, 1 }
  0x2b   : > { %262 = sbr.rel (%p599_p13) target bundleno = 50 (0x32), region = 70  ;;  %vm263_vm0 = vcmask (!%p599_p13), 15360   ;;  %v762_v8 = vmov (!%p599_p13), 0.0  }
  0x2c   : > { %s613_s24 = sshll.u32 %s254_s22, 5 }
  0x2d   : > { %s856_s28 = scalar_lea.vmem %s926_s3, %s613_s24 }
  0x2e   : > { %264 = vst.msk [vmem:[%s856_s28] sm:$0xff] (!%p599_p13), %vm263_vm0, %v762_v8  ;;  %265 = vst.msk [vmem:[%s856_s28 + $0x8] sm:$0xff] (!%p599_p13), %vm263_vm0, %v762_v8 }
  0x2f   : > { %266 = vst.msk [vmem:[%s856_s28 + $0x10] sm:$0xff] (!%p599_p13), %vm263_vm0, %v762_v8  ;;  %267 = vst.msk [vmem:[%s856_s28 + $0x18] sm:$0xff] (!%p599_p13), %vm263_vm0, %v762_v8 }
  0x32 PF: > { %v268_v9 = vld [vmem:[%s228_s29] sm:$0xff]  ;;  %v269_v10 = vld [vmem:[%s228_s29 + $0x8] sm:$0xff]  ;;  %v270_v11 = vld [vmem:[%s228_s29 + $0x10] sm:$0xff]  ;;  %vm294_vm1 = vcmask 523264   ;;  %vm390_vm2 = vcmask 7168   ;;  %vm415_vm3 = vcmask 15368  }
  0x33   : > { %v276_v12 = vpack.c.bf16 %v269_v10, %v268_v9  ;;  %v271_v13 = vld [vmem:[%s228_s29 + $0x18] sm:$0xff]  ;;  %v272_v15 = vld [vmem:[%s228_s29 + $0x20] sm:$0xff]  ;;  %v273_v16 = vld [vmem:[%s228_s29 + $0x28] sm:$0xff]  ;;  %s609_s7 = sshll.u32 (%p831_p6), %s748_s15, 3 }
  0x34   : > { %v277_v14 = vpack.c.bf16 %v271_v13, %v270_v11  ;;  %v704_v17 = vld [vmem:[%s924_s1] sm:$0xff]   ;;  %v278_v18 = vpack.c.bf16 %v273_v16, %v272_v15  ;;  %v274_v19 = vld [vmem:[%s228_s29 + $0x30] sm:$0xff]  ;;  %v275_v20 = vld [vmem:[%s228_s29 + $0x38] sm:$0xff]  ;;  %s433_s8 = sadd.s32 (%p831_p6), %s744_s14, %s609_s7 }
  0x35   : > { %635 = vmatprep.subr.bf16.mxu0 %v276_v12  ;;  %643 = vmatprep.mubr.msk.bf16.mxu0 %vm294_vm1, %v704_v17  ;;  %v279_v21 = vpack.c.bf16 %v275_v20, %v274_v19  ;;  %v705_v22 = vld [vmem:[%s924_s1 + $0x8] sm:$0xff]   ;;  %v374_v38 = vld [vmem:[%s856_s28] sm:$0xff]  ;;  %s610_s9 = sshll.u32 (%p831_p6), %s433_s8, 2 }
  0x36   : > { %636 = vmatpush3.bf16.msra.mxu0 %v276_v12  ;;  %v376_v37 = vld [vmem:[%s856_s28 + $0x10] sm:$0xff]  ;;  %v377_v43 = vld [vmem:[%s856_s28 + $0x18] sm:$0xff]  ;;  %v375_v44 = vld [vmem:[%s856_s28 + $0x8] sm:$0xff]  ;;  %s435_s21 = scalar_lea.vmem (%p831_p6), %s925_s2, %s610_s9 }
  0x37   : > { %637 = vmatprep.subr.bf16.mxu0 %v277_v14 }
  0x3a   : > { %638 = vmatpush3.bf16.msra.mxu0 %v277_v14 }
  0x3b   : > { %639 = vmatprep.subr.bf16.mxu0 %v278_v18 }
  0x3e   : > { %640 = vmatpush3.bf16.msra.mxu0 %v278_v18 }
  0x3f   : > { %641 = vmatprep.subr.bf16.mxu0 %v279_v21 }
  0x42   : > { %642 = vmatpush3.bf16.msra.mxu0 %v279_v21 }
  0x45   : > { %644 = vmatmul.mubr.msk.bf16.vlgmr.msra.gmra.mrb[0].mxu0 %vm294_vm1, %v705_v22 }
 0x118   : > { %v645_v23 = vpop.f32.mrb[0].mxu0 }
 0x119   : > { %v335_v24 = vpop.f32.mrb[1].mxu0 }
 0x11a   : > { %v646_v25 = vpop.f32.mrb[2].mxu0 }
 0x11b   : > { %v351_v26 = vpack.c.bf16 %v646_v25, %v645_v23  ;;  %v338_v27 = vpop.f32.mrb[3].mxu0 }
 0x11c   : > { %v350_v28 = vpack.c.bf16 %v338_v27, %v335_v24 }
 0x11d   : > { %628 = vst [vmem:[%s858_s30 + $0x8] sm:$0xff] %v351_v26   ;;  %v372_v29 = vunpack.c.l.bf16 %v351_v26  ;;  %v373_v31 = vunpack.c.h.bf16 %v351_v26 }
 0x11e   : > { %622 = vst [vmem:[%s858_s30] sm:$0xff] %v350_v28   ;;  %v370_v30 = vunpack.c.l.bf16 %v350_v28  ;;  %v371_v32 = vunpack.c.h.bf16 %v350_v28 }
 0x11f   : > { %382 = vadd.xlane.f32.xlu1 %v372_v29  ;;  %v402_v35 = vmul.f32 %v373_v31, %v373_v31  ;;  %v401_v36 = vmul.f32 %v372_v29, %v372_v29 }
 0x120   : > { %378 = vadd.xlane.f32.xlu0 %v370_v30  ;;  %v400_v33 = vmul.f32 %v371_v32, %v371_v32  ;;  %v399_v34 = vmul.f32 %v370_v30, %v370_v30 }
 0x123   : > { %384 = vadd.xlane.f32.xlu1 %v373_v31 }
 0x124   : > { %380 = vadd.xlane.f32.xlu0 %v371_v32  ;;  %v455_v63 = vld [vmem:[%s858_s30 + $0x8] sm:$0xf] (%p831_p6)  ;;  %v457_v0 = vld [vmem:[%s858_s30 + $0xc] sm:$0xf] (%p831_p6) }
 0x125   : > { %v451_v61 = vld [vmem:[%s858_s30] sm:$0xf] (%p831_p6)  ;;  %v453_v62 = vld [vmem:[%s858_s30 + $0x4] sm:$0xf] (%p831_p6)  ;;  %456 = vst [vmem:[%s435_s21 + $0x10] sm:$0xf] (%p831_p6), %v455_v63 }
 0x126   : > { %452 = vst [vmem:[%s435_s21] sm:$0xf] (%p831_p6), %v451_v61  ;;  %454 = vst [vmem:[%s435_s21 + $0x8] sm:$0xf] (%p831_p6), %v453_v62 }
 0x127   : > { %405 = vadd.xlane.f32.xlu1 %v400_v33  ;;  %458 = vst [vmem:[%s435_s21 + $0x18] sm:$0xf] (%p831_p6), %v457_v0 }
 0x128   : > { %403 = vadd.xlane.f32.xlu0 %v399_v34 }
 0x12b   : > { %409 = vadd.xlane.f32.xlu1 %v402_v35 }
 0x12c   : > { %407 = vadd.xlane.f32.xlu0 %v401_v36 }
 0x1ac   : > { %v383_v39 = vpop.xlane.xlu1 %382 }
 0x1ad   : > { %v388_v40 = vadd.f32 %v383_v39, %v376_v37  ;;  %v379_v41 = vpop.xlane.xlu0 %378 }
 0x1ae   : > { %v386_v42 = vadd.f32 %v379_v41, %v374_v38 }
 0x1af   : > { %393 = vst.msk [vmem:[%s856_s28 + $0x10] sm:$0xff] %vm390_vm2, %v388_v40 }
 0x1b0   : > { %391 = vst.msk [vmem:[%s856_s28] sm:$0xff] %vm390_vm2, %v386_v42  ;;  %v385_v45 = vpop.xlane.xlu1 %384 }
 0x1b1   : > { %v389_v46 = vadd.f32 %v385_v45, %v377_v43  ;;  %v381_v47 = vpop.xlane.xlu0 %380 }
 0x1b2   : > { %v387_v48 = vadd.f32 %v381_v47, %v375_v44 }
 0x1b3   : > { %394 = vst.msk [vmem:[%s856_s28 + $0x18] sm:$0xff] %vm390_vm2, %v389_v46 }
 0x1b4   : > { %392 = vst.msk [vmem:[%s856_s28 + $0x8] sm:$0xff] %vm390_vm2, %v387_v48  ;;  %v406_v49 = vpop.xlane.xlu1 %405 }
 0x1b5   : > { %v404_v50 = vpop.xlane.xlu0 %403 }
 0x1b6   : > { %v397_v53 = vld [vmem:[%s856_s28 + $0x10] sm:$0xff] }
 0x1b7   : > { %v395_v51 = vld [vmem:[%s856_s28] sm:$0xff] }
 0x1b8   : > { %v411_v52 = vadd.f32 %v404_v50, %v395_v51  ;;  %v410_v56 = vpop.xlane.xlu1 %409  ;;  %431 = sbr.rel (!%p831_p6) target bundleno = 447 (0x1bf), region = 74 }
 0x1b9   : > { %v408_v54 = vpop.xlane.xlu0 %407 }
 0x1ba   : > { %416 = vst.msk [vmem:[%s856_s28] sm:$0xff] %vm415_vm3, %v411_v52  ;;  %v398_v55 = vld [vmem:[%s856_s28 + $0x18] sm:$0xff]  ;;  %v413_v57 = vadd.f32 %v408_v54, %v397_v53 }
 0x1bb   : > { %v396_v58 = vld [vmem:[%s856_s28 + $0x8] sm:$0xff]  ;;  %v414_v59 = vadd.f32 %v410_v56, %v398_v55 }
 0x1bc   : > { %v412_v60 = vadd.f32 %v406_v49, %v396_v58  ;;  %418 = vst.msk [vmem:[%s856_s28 + $0x10] sm:$0xff] %vm415_vm3, %v413_v57 }
 0x1bd   : > { %419 = vst.msk [vmem:[%s856_s28 + $0x18] sm:$0xff] %vm415_vm3, %v414_v59 }
 0x1be   : > { %417 = vst.msk [vmem:[%s856_s28 + $0x8] sm:$0xff] %vm415_vm3, %v412_v60 }
 0x1bf PF: > { %s14_s18 = sadd.s32 1, %s760_s18   ;;  %s928_s12 = smov %s740_s13 }
 0x1c0   : > { %p11_p0 = scmp.ge.s32.totalorder %s14_s18, 6   ;;  %s929_s13 = smov %s839_s27 }
 0x1c1   : > { %s930_s14 = smov %s752_s16  ;;  %s931_s15 = smov %s756_s17 }
 0x1c2   : > { %s932_s16 = smov %s935_s19  ;;  %s933_s17 = smov %s939_s20 }
 0x1c3   :  { %13 = sbr.rel (!%p11_p0) target bundleno = 4 (0x4), region = 158 }

// kernel: residual_block3_pallas.6
= control target key start
LH: loop header
LB: loop body
LE: loop exit
PB: predicated region body
PF: predicated region fallthrough
CT: control target
= control target key end

     0   :  { %s822_s15 = smov 0   ;;  %s824_s16 = smov 0   ;;  %s1017_s0 = inlined_call_operand.vmem [shape: bf16[2,32,256], index: 0, kind: input, shape index: {}]   ;;  %s1018_s1 = inlined_call_operand.vmem [shape: bf16[64,32], index: 1, kind: input, shape index: {}]   ;;  %s1019_s2 = inlined_call_operand.vmem [shape: f32[32,1], index: 2, kind: input, shape index: {}]   ;;  %s1020_s3 = inlined_call_operand.vmem [shape: f32[32,1], index: 3, kind: input, shape index: {}]   ;;  %s1021_s4 = inlined_call_operand.vmem [shape: f32[2,64,2], index: 4, kind: output, shape index: {}]  }
   0x1   :  { %s826_s17 = smov 0   ;;  %s828_s18 = smov 0  }
   0x2   :  { %s830_s19 = smov 0   ;;  %s832_s20 = smov 0  }
   0x3   :  { %s834_s21 = smov 0  }
   0x4 LB: > { %s23_s22 = sadd.s32 1, %s785_s19  ;;  %s26_s23 = sadd.s32 1, %s789_s20  ;;  %s793_s21 = sphi %s834_s21, %s14_s21   ;;  %s789_s20 = sphi %s832_s20, %s1027_s20   ;;  %s785_s19 = sphi %s830_s19, %s1026_s19   ;;  %s781_s18 = sphi %s828_s18, %s1025_s18   ;;  %s777_s17 = sphi %s826_s17, %s1024_s17   ;;  %s773_s16 = sphi %s824_s16, %s1023_s16   ;;  %s769_s15 = sphi %s822_s15, %s1022_s15  }
   0x5   : > { %p24_p0 = scmp.ge.s32.totalorder %s23_s22, 2  ;;  %p42_p1 = scmp.ne.s32.totalorder %s773_s16, %s769_s15 }
   0x6   : > { %p43_p2 = scmp.eq.s32.totalorder %s793_s21, 0  ;;  %s35_s27 = sadd.s32 1, %s773_s16 }
   0x7   : > { %s1029_s22 = smov (%p24_p0, %s23_s22), 0  ;;  %s1031_s23 = smov (!%p24_p0, %s26_s23), %s789_s20 }
   0x8   : > { %p44_p3 = por %p43_p2, %p42_p1  ;;  %p28_p4 = scmp.ge.s32.totalorder %s1031_s23, 2 }
   0x9   : > { %s31_s24 = ssub.s32 %s785_s19, %s1029_s22  ;;  %p624_p6 = scmp.ge.s32.totalorder %s793_s21, 4 }
   0xa   : > { %s1033_s23 = smov (%p28_p4, %s1031_s23), 0 }
   0xb   : > { %s30_s25 = ssub.s32 %s789_s20, %s1033_s23  ;;  %166 = sbr.rel (%p624_p6) target bundleno = 26 (0x1a), region = 28 }
   0xc   : > { %s32_s26 = sor.u32 %s31_s24, %s30_s25 }
   0xd   : > { %p33_p5 = scmp.eq.s32.totalorder %s32_s26, 0 }
   0xf   : > { %s873_s28 = scalar_select %p33_p5, %s773_s16, %s35_s27  }
  0x12   : > { %169 = sbr.rel (!%p44_p3) target bundleno = 26 (0x1a), region = 32  ;;  %s171_s29 = sand.u32 (%p44_p3), 1, %s773_s16  }
  0x13   : > { %s626_s30 = sshll.u32 (%p44_p3), %s789_s20, 3  ;;  %s625_s5 = sshll.u32 (%p44_p3), %s171_s29, 4 }
  0x14   : > { %s175_s6 = sadd.s32 (%p44_p3), %s785_s19, %s626_s30  ;;  %s173_s11 = scalar_lea.vmem (%p44_p3), [#allocation2], %s625_s5 }
  0x15   : > { %s627_s7 = sshll.u32 (%p44_p3), %s175_s6, 2 }
  0x16   : > { %s177_s10 = scalar_lea.vmem (%p44_p3), %s1017_s0, %s627_s7 }
  0x17   : > { %v193_v0 = vld [vmem:[%s177_s10] sm:$0xf] (%p44_p3)  ;;  %v195_v1 = vld [vmem:[%s177_s10 + $0x8] sm:$0xf] (%p44_p3)  ;;  %v197_v2 = vld [vmem:[%s177_s10 + $0x10] sm:$0xf] (%p44_p3) }
  0x18   : > { %194 = vst [vmem:[%s173_s11] sm:$0xf] (%p44_p3), %v193_v0  ;;  %196 = vst [vmem:[%s173_s11 + $0x4] sm:$0xf] (%p44_p3), %v195_v1  ;;  %v199_v3 = vld [vmem:[%s177_s10 + $0x18] sm:$0xf] (%p44_p3) }
  0x19   : > { %198 = vst [vmem:[%s173_s11 + $0x8] sm:$0xf] %v197_v2  ;;  %200 = vst [vmem:[%s173_s11 + $0xc] sm:$0xf] %v199_v3 }
  0x1a PF: > { %p628_p7 = scmp.ge.s32.totalorder %s793_s21, 1  ;;  %p230_p8 = scmp.lt.s32.totalorder %s793_s21, 5 }
  0x1c   : > { %p231_p9 = pnand %p628_p7, %p230_p8 }
  0x1d   : > { %s237_s12 = sand.u32 (!%p231_p9), 1, %s769_s15   ;;  %p262_p10 = scmp.lt.s32.totalorder (!%p231_p9), %s781_s18, 1 }
  0x1e   : > { %234 = sbr.rel (%p231_p9) target bundleno = 585 (0x249), region = 73  ;;  %s886_s13 = sshll.u32 (!%p231_p9), %s237_s12, 4 }
  0x1f   : > { %s239_s27 = scalar_lea.vmem (!%p231_p9), [#allocation2], %s886_s13  ;;  %p632_p11 = scmp.ne.s32.totalorder (!%p231_p9), %s777_s17, 0 }
  0x25   : > { %s1035_s18 = smov (!%p262_p10, %s781_s18), 1  ;;  %271 = sbr.rel (%p632_p11) target bundleno = 44 (0x2c), region = 81 }
  0x26   : > { %s643_s14 = sshll.u32 %s1035_s18, 6  ;;  %vm272_vm0 = vcmask (!%p632_p11), 15360   ;;  %v795_v4 = vmov (!%p632_p11), 0.0  }
  0x27   : > { %s892_s26 = scalar_lea.vmem %s1021_s4, %s643_s14 }
  0x28   : > { %273 = vst.msk [vmem:[%s892_s26] sm:$0xff] (!%p632_p11), %vm272_vm0, %v795_v4  ;;  %274 = vst.msk [vmem:[%s892_s26 + $0x8] sm:$0xff] (!%p632_p11), %vm272_vm0, %v795_v4 }
  0x29   : > { %275 = vst.msk [vmem:[%s892_s26 + $0x10] sm:$0xff] (!%p632_p11), %vm272_vm0, %v795_v4  ;;  %276 = vst.msk [vmem:[%s892_s26 + $0x18] sm:$0xff] (!%p632_p11), %vm272_vm0, %v795_v4 }
  0x2a   : > { %277 = vst.msk [vmem:[%s892_s26 + $0x20] sm:$0xff] (!%p632_p11), %vm272_vm0, %v795_v4  ;;  %278 = vst.msk [vmem:[%s892_s26 + $0x28] sm:$0xff] (!%p632_p11), %vm272_vm0, %v795_v4 }
  0x2b   : > { %279 = vst.msk [vmem:[%s892_s26 + $0x30] sm:$0xff] (!%p632_p11), %vm272_vm0, %v795_v4  ;;  %280 = vst.msk [vmem:[%s892_s26 + $0x38] sm:$0xff] (!%p632_p11), %vm272_vm0, %v795_v4 }
  0x2c PF: > { %v317_v5 = vld [vmem:[%s1020_s3] sm:$0xff]  ;;  %v796_v7 = vmov 0   ;;  %v318_v8 = vld [vmem:[%s1020_s3 + $0x8] sm:$0xff]  ;;  %v292_v10 = vld [vmem:[%s1019_s2 + $0x18] sm:$0xff]  ;;  %vm379_vm1 = vcmask 261120   ;;  %vm489_vm2 = vcmask 7168  }
  0x2d   : > { %v289_v6 = vld [vmem:[%s1019_s2] sm:$0xff]  ;;  %734 = vset.pattern.permute.xlu1 %v796_v7  ;;  %733 = vset.pattern.permute.xlu0 %v796_v7  ;;  %v290_v9 = vld [vmem:[%s1019_s2 + $0x8] sm:$0xff]  ;;  %v291_v11 = vld [vmem:[%s1019_s2 + $0x10] sm:$0xff]  ;;  %vm538_vm3 = vcmask 15368  }
  0x2e   : > { %323 = vperm.xlu1 %734, %v317_v5   ;;  %295 = vperm.xlu0 %733, %v289_v6   ;;  %v320_v12 = vld [vmem:[%s1020_s3 + $0x18] sm:$0xff]  ;;  %v319_v13 = vld [vmem:[%s1020_s3 + $0x10] sm:$0xff]  ;;  %v735_v14 = vld [vmem:[%s1018_s1] sm:$0xff]  }
  0x2f   : > { %v736_v15 = vld [vmem:[%s1018_s1 + $0x10] sm:$0xff]   ;;  %663 = vmatprep.mubr.msk.bf16.mxu0 %vm379_vm1, %v735_v14  ;;  %v652_v24 = vld [vmem:[%s239_s27 + $0x8] sm:$0xff]   ;;  %v457_v5 = vld [vmem:[%s892_s26] sm:$0xff] }
  0x30   : > { %667 = vmatprep.mubr.msk.bf16.mxu1 %vm379_vm1, %v736_v15  ;;  %v645_v16 = vld [vmem:[%s239_s27] sm:$0xff]   ;;  %v651_v28 = vunpack.c.h.bf16 %v652_v24  ;;  %v650_v29 = vunpack.c.l.bf16 %v652_v24  ;;  %v737_v44 = vld [vmem:[%s1018_s1 + $0x8] sm:$0xff]   ;;  %v738_v45 = vld [vmem:[%s1018_s1 + $0x18] sm:$0xff]  }
  0x31   : > { %v646_v17 = vunpack.c.l.bf16 %v645_v16  ;;  %v647_v21 = vunpack.c.h.bf16 %v645_v16  ;;  %v459_v63 = vld [vmem:[%s892_s26 + $0x10] sm:$0xff]  ;;  %v461_v4 = vld [vmem:[%s892_s26 + $0x20] sm:$0xff]  ;;  %v458_v16 = vld [vmem:[%s892_s26 + $0x8] sm:$0xff] }
  0x32   : > { %328 = vperm.xlu1 %734, %v318_v8   ;;  %300 = vperm.xlu0 %733, %v290_v9   ;;  %v463_v62 = vld [vmem:[%s892_s26 + $0x30] sm:$0xff]  ;;  %v464_v15 = vld [vmem:[%s892_s26 + $0x38] sm:$0xff] }
  0x36   : > { %310 = vperm.xlu1 %734, %v292_v10   ;;  %305 = vperm.xlu0 %733, %v291_v11   ;;  %v460_v10 = vld [vmem:[%s892_s26 + $0x18] sm:$0xff] }
  0x3a   : > { %338 = vperm.xlu1 %734, %v320_v12   ;;  %333 = vperm.xlu0 %733, %v319_v13  }
  0xad   : > { %v324_v18 = vpop.permute.xlu1 %323  ;;  %v296_v19 = vpop.permute.xlu0 %295 }
  0xae   : > { %v313_v20 = vmul.f32 %v646_v17, %v296_v19 }
  0xb0   : > { %v341_v25 = vadd.f32 %v324_v18, %v313_v20 }
  0xb1   : > { %v329_v22 = vpop.permute.xlu1 %328  ;;  %v301_v23 = vpop.permute.xlu0 %300 }
  0xb2   : > { %v314_v26 = vmul.f32 %v647_v21, %v301_v23  ;;  %v345_v32 = vmax.f32 %v341_v25, 0.0 }
  0xb4   : > { %v342_v27 = vadd.f32 %v329_v22, %v314_v26  ;;  %v462_v22 = vld [vmem:[%s892_s26 + $0x28] sm:$0xff] }
  0xb5   : > { %v311_v30 = vpop.permute.xlu1 %310  ;;  %v306_v31 = vpop.permute.xlu0 %305 }
  0xb6   : > { %v346_v33 = vmax.f32 %v342_v27, 0.0  ;;  %v316_v35 = vmul.f32 %v651_v28, %v311_v30  ;;  %v315_v36 = vmul.f32 %v650_v29, %v306_v31 }
  0xb8   : > { %v349_v34 = vpack.c.bf16 %v346_v33, %v345_v32 }
  0xb9   : > { %v339_v37 = vpop.permute.xlu1 %338  ;;  %v334_v38 = vpop.permute.xlu0 %333 }
  0xba   : > { %v344_v39 = vadd.f32 %v339_v37, %v316_v35  ;;  %v343_v40 = vadd.f32 %v334_v38, %v315_v36  ;;  %659 = vmatprep.subr.bf16.mxu0 %v349_v34  ;;  %671 = vmatprep.subr.bf16.mxu1 %v349_v34 }
  0xbb   : > { %660 = vmatpush3.bf16.msra.mxu0 %v349_v34  ;;  %673 = vmatpush3.bf16.msra.mxu1 %v349_v34 }
  0xbc   : > { %v348_v41 = vmax.f32 %v344_v39, 0.0  ;;  %v347_v42 = vmax.f32 %v343_v40, 0.0 }
  0xbe   : > { %v350_v43 = vpack.c.bf16 %v348_v41, %v347_v42 }
  0xc0   : > { %661 = vmatprep.subr.bf16.mxu0 %v350_v43  ;;  %672 = vmatprep.subr.bf16.mxu1 %v350_v43 }
  0xc1   : > { %662 = vmatpush3.bf16.msra.mxu0 %v350_v43  ;;  %674 = vmatpush3.bf16.msra.mxu1 %v350_v43 }
  0xc4   : > { %664 = vmatmul.mubr.msk.bf16.vlgmr.msra.gmra.mrb[0].mxu0 %vm379_vm1, %v737_v44  ;;  %668 = vmatmul.mubr.msk.bf16.vlgmr.msra.gmra.mrb[0].mxu1 %vm379_vm1, %v738_v45 }
 0x197   : > { %v665_v46 = vpop.f32.mrb[0].mxu0  ;;  %v669_v47 = vpop.f32.mrb[0].mxu1 }
 0x198   : > { %477 = vadd.xlane.f32.xlu1 %v669_v47  ;;  %469 = vadd.xlane.f32.xlu0 %v665_v46  ;;  %v426_v48 = vpop.f32.mrb[1].mxu0  ;;  %v442_v49 = vpop.f32.mrb[1].mxu1  ;;  %v508_v54 = vmul.f32 %v665_v46, %v665_v46  ;;  %v512_v59 = vmul.f32 %v669_v47, %v669_v47 }
 0x199   : > { %v666_v50 = vpop.f32.mrb[2].mxu0  ;;  %v670_v51 = vpop.f32.mrb[2].mxu1  ;;  %v506_v55 = vmul.f32 %v426_v48, %v426_v48  ;;  %v510_v57 = vmul.f32 %v442_v49, %v442_v49 }
 0x19a   : > { %v429_v52 = vpop.f32.mrb[3].mxu0  ;;  %v445_v53 = vpop.f32.mrb[3].mxu1  ;;  %v509_v56 = vmul.f32 %v666_v50, %v666_v50  ;;  %v513_v61 = vmul.f32 %v670_v51, %v670_v51 }
 0x19b   : > { %v507_v58 = vmul.f32 %v429_v52, %v429_v52  ;;  %v511_v60 = vmul.f32 %v445_v53, %v445_v53 }
 0x19c   : > { %473 = vadd.xlane.f32.xlu1 %v442_v49  ;;  %465 = vadd.xlane.f32.xlu0 %v426_v48 }
 0x1a0   : > { %518 = vadd.xlane.f32.xlu1 %v508_v54  ;;  %471 = vadd.xlane.f32.xlu0 %v666_v50 }
 0x1a4   : > { %479 = vadd.xlane.f32.xlu0 %v670_v51  ;;  %467 = vadd.xlane.f32.xlu1 %v429_v52 }
 0x1a8   : > { %475 = vadd.xlane.f32.xlu0 %v445_v53  ;;  %514 = vadd.xlane.f32.xlu1 %v506_v55 }
 0x1ac   : > { %520 = vadd.xlane.f32.xlu0 %v509_v56  ;;  %522 = vadd.xlane.f32.xlu1 %v510_v57 }
 0x1b0   : > { %526 = vadd.xlane.f32.xlu1 %v512_v59  ;;  %516 = vadd.xlane.f32.xlu0 %v507_v58 }
 0x1b4   : > { %524 = vadd.xlane.f32.xlu0 %v511_v60 }
 0x1b8   : > { %528 = vadd.xlane.f32.xlu0 %v513_v61 }
 0x225   : > { %v478_v0 = vpop.xlane.xlu1 %477  ;;  %v470_v1 = vpop.xlane.xlu0 %469 }
 0x226   : > { %v487_v2 = vadd.f32 %v478_v0, %v463_v62  ;;  %v483_v3 = vadd.f32 %v470_v1, %v459_v63 }
 0x228   : > { %496 = vst.msk [vmem:[%s892_s26 + $0x30] sm:$0xff] %vm489_vm2, %v487_v2  ;;  %492 = vst.msk [vmem:[%s892_s26 + $0x10] sm:$0xff] %vm489_vm2, %v483_v3 }
 0x229   : > { %v474_v6 = vpop.xlane.xlu1 %473  ;;  %v466_v7 = vpop.xlane.xlu0 %465 }
 0x22a   : > { %v485_v8 = vadd.f32 %v474_v6, %v461_v4  ;;  %v481_v9 = vadd.f32 %v466_v7, %v457_v5 }
 0x22c   : > { %494 = vst.msk [vmem:[%s892_s26 + $0x20] sm:$0xff] %vm489_vm2, %v485_v8  ;;  %490 = vst.msk [vmem:[%s892_s26] sm:$0xff] %vm489_vm2, %v481_v9 }
 0x22d   : > { %v519_v11 = vpop.xlane.xlu1 %518  ;;  %v472_v12 = vpop.xlane.xlu0 %471 }
 0x22e   : > { %v484_v13 = vadd.f32 %v472_v12, %v460_v10 }
 0x22f   : > { %v500_v14 = vld [vmem:[%s892_s26 + $0x10] sm:$0xff] }
 0x230   : > { %v532_v17 = vadd.f32 %v519_v11, %v500_v14  ;;  %493 = vst.msk [vmem:[%s892_s26 + $0x18] sm:$0xff] %vm489_vm2, %v484_v13  ;;  %v504_v34 = vld [vmem:[%s892_s26 + $0x30] sm:$0xff] }
 0x231   : > { %v480_v18 = vpop.xlane.xlu0 %479  ;;  %v468_v19 = vpop.xlane.xlu1 %467 }
 0x232   : > { %541 = vst.msk [vmem:[%s892_s26 + $0x10] sm:$0xff] %vm538_vm3, %v532_v17  ;;  %v488_v20 = vadd.f32 %v480_v18, %v464_v15  ;;  %v482_v21 = vadd.f32 %v468_v19, %v458_v16 }
 0x233   : > { %v498_v24 = vld [vmem:[%s892_s26] sm:$0xff] }
 0x234   : > { %497 = vst.msk [vmem:[%s892_s26 + $0x38] sm:$0xff] %vm489_vm2, %v488_v20  ;;  %491 = vst.msk [vmem:[%s892_s26 + $0x8] sm:$0xff] %vm489_vm2, %v482_v21  ;;  %v502_v30 = vld [vmem:[%s892_s26 + $0x20] sm:$0xff] }
 0x235   : > { %v476_v23 = vpop.xlane.xlu0 %475  ;;  %v515_v25 = vpop.xlane.xlu1 %514 }
 0x236   : > { %v486_v26 = vadd.f32 %v476_v23, %v462_v22  ;;  %v530_v27 = vadd.f32 %v515_v25, %v498_v24 }
 0x237   : > { %v501_v28 = vld [vmem:[%s892_s26 + $0x18] sm:$0xff] }
 0x238   : > { %495 = vst.msk [vmem:[%s892_s26 + $0x28] sm:$0xff] %vm489_vm2, %v486_v26 }
 0x239   : > { %539 = vst.msk [vmem:[%s892_s26] sm:$0xff] %vm538_vm3, %v530_v27  ;;  %v521_v29 = vpop.xlane.xlu0 %520  ;;  %v523_v31 = vpop.xlane.xlu1 %522 }
 0x23a   : > { %v533_v32 = vadd.f32 %v521_v29, %v501_v28  ;;  %v534_v33 = vadd.f32 %v523_v31, %v502_v30 }
 0x23b   : > { %v499_v36 = vld [vmem:[%s892_s26 + $0x8] sm:$0xff]  ;;  %v505_v43 = vld [vmem:[%s892_s26 + $0x38] sm:$0xff] }
 0x23c   : > { %542 = vst.msk [vmem:[%s892_s26 + $0x18] sm:$0xff] %vm538_vm3, %v533_v32  ;;  %543 = vst.msk [vmem:[%s892_s26 + $0x20] sm:$0xff] %vm538_vm3, %v534_v33 }
 0x23d   : > { %v527_v35 = vpop.xlane.xlu1 %526  ;;  %v517_v37 = vpop.xlane.xlu0 %516 }
 0x23e   : > { %v536_v38 = vadd.f32 %v527_v35, %v504_v34  ;;  %v531_v39 = vadd.f32 %v517_v37, %v499_v36 }
 0x23f   : > { %v503_v40 = vld [vmem:[%s892_s26 + $0x28] sm:$0xff] }
 0x240   : > { %545 = vst.msk [vmem:[%s892_s26 + $0x30] sm:$0xff] %vm538_vm3, %v536_v38  ;;  %540 = vst.msk [vmem:[%s892_s26 + $0x8] sm:$0xff] %vm538_vm3, %v531_v39 }
 0x241   : > { %v525_v41 = vpop.xlane.xlu0 %524 }
 0x242   : > { %v535_v42 = vadd.f32 %v525_v41, %v503_v40 }
 0x244   : > { %544 = vst.msk [vmem:[%s892_s26 + $0x28] sm:$0xff] %vm538_vm3, %v535_v42 }
 0x245   : > { %v529_v44 = vpop.xlane.xlu0 %528 }
 0x246   : > { %v537_v45 = vadd.f32 %v529_v44, %v505_v43 }
 0x248   : > { %546 = vst.msk [vmem:[%s892_s26 + $0x38] sm:$0xff] %vm538_vm3, %v537_v45 }
 0x249 PF: > { %s14_s21 = sadd.s32 1, %s793_s21   ;;  %s1022_s15 = smov %s773_s16 }
 0x24a   : > { %p11_p12 = scmp.ge.s32.totalorder %s14_s21, 6   ;;  %s1023_s16 = smov %s873_s28 }
 0x24b   : > { %s1024_s17 = smov %s785_s19  ;;  %s1025_s18 = smov %s789_s20 }
 0x24c   : > { %s1026_s19 = smov %s1029_s22  ;;  %s1027_s20 = smov %s1033_s23 }
 0x24d   :  { %13 = sbr.rel (!%p11_p12) target bundleno = 4 (0x4), region = 116 }

// kernel: residual_block3_pallas.5
= control target key start
LH: loop header
LB: loop body
LE: loop exit
PB: predicated region body
PF: predicated region fallthrough
CT: control target
= control target key end

     0   :  { %s1888_s21 = smov 0   ;;  %s2216_s0 = inlined_call_operand.vmem [shape: bf16[2,32,256], index: 0, kind: input, shape index: {}]   ;;  %s2217_s1 = inlined_call_operand.vmem [shape: s32[1,256], index: 1, kind: input, shape index: {}]   ;;  %s2218_s2 = inlined_call_operand.vmem [shape: bf16[9,32,32], index: 2, kind: input, shape index: {}]   ;;  %s2219_s3 = inlined_call_operand.vmem [shape: f32[32,1], index: 3, kind: input, shape index: {}]   ;;  %s2220_s4 = inlined_call_operand.vmem [shape: f32[32,1], index: 4, kind: input, shape index: {}]   ;;  %s2221_s5 = inlined_call_operand.vmem [shape: bf16[2,32,256], index: 5, kind: output, shape index: {0}]   ;;  %s2222_s6 = inlined_call_operand.vmem [shape: f32[2,32,2], index: 6, kind: output, shape index: {1}]  }
   0x1 LB: > { %s1609_s22 = sadd.s32 4294967295, %s1842_s21   ;;  %p1613_p0 = scmp.ge.s32.totalorder %s1842_s21, 1  ;;  %s1842_s21 = sphi %s1888_s21, %s17_s21  }
   0x2   : > { %p215_p1 = scmp.lt.s32.totalorder %s1842_s21, 3 }
   0x4   : > { %p216_p2 = pnand %p1613_p0, %p215_p1 }
   0x5   : > { %v316_v0 = vld [vmem:[%s2220_s4] sm:$0xff] (!%p216_p2)  ;;  %v374_v2 = vlaneseq (!%p216_p2)  ;;  %v1844_v3 = vmov (!%p216_p2), 0   ;;  %v317_v6 = vld [vmem:[%s2220_s4 + $0x8] sm:$0xff] (!%p216_p2)  ;;  %v287_v11 = vld [vmem:[%s2219_s3 + $0x18] sm:$0xff] (!%p216_p2)  ;;  %s1845_s17 = smov (!%p216_p2), 1   ;;  %s1846_s18 = smov (!%p216_p2), 111  }
   0x6   : > { %219 = sbr.rel (%p216_p2) target bundleno = 722 (0x2d2), region = 40  ;;  %v284_v1 = vld [vmem:[%s2219_s3] sm:$0xff] (!%p216_p2)  ;;  %1787 = vset.pattern.permute.xlu1 (!%p216_p2), %v1844_v3  ;;  %1786 = vset.pattern.permute.xlu0 (!%p216_p2), %v1844_v3  ;;  %v285_v7 = vld [vmem:[%s2219_s3 + $0x8] sm:$0xff] (!%p216_p2)  ;;  %v286_v13 = vld [vmem:[%s2219_s3 + $0x10] sm:$0xff] (!%p216_p2)  ;;  %s1847_s19 = smov (!%p216_p2), 15   ;;  %vm804_vm8 = vcmask (!%p216_p2), 7168  }
   0x7   : > { %322 = vperm.xlu1 (!%p216_p2), %1787, %v316_v0   ;;  %290 = vperm.xlu0 (!%p216_p2), %1786, %v284_v1   ;;  %v364_v4 = vld [vmem:[%s2217_s1] sm:$0x3] (!%p216_p2)  ;;  %v375_v5 = vshrl.u32 (!%p216_p2), %v374_v2, 7  ;;  %v319_v19 = vld [vmem:[%s2220_s4 + $0x18] sm:$0xff] (!%p216_p2)  ;;  %v318_v20 = vld [vmem:[%s2220_s4 + $0x10] sm:$0xff] (!%p216_p2)  ;;  %s1848_s20 = smov (!%p216_p2), 113  }
   0x8   : > { %vm366_vm0 = vcmp.le.s32.totalorder (!%p216_p2), %v364_v4, 14  ;;  %vm365_vm1 = vcmp.ge.s32.totalorder (!%p216_p2), %v364_v4, 1  ;;  %494 = vmatprep.mubr.bf16.mxu1 (!%p216_p2), %v1844_v3  ;;  %933 = vmatprep.mubr.bf16.mxu0 (!%p216_p2), %v1844_v3  ;;  %s1849_s23 = smov (!%p216_p2), 127   ;;  %s1850_s24 = smov (!%p216_p2), 17   ;;  %vm398_vm9 = vcmask (!%p216_p2), 908288   ;;  %vm455_vm10 = vcmask (!%p216_p2), 261120  }
   0x9   : > { %v376_v8 = vsub.s32 (!%p216_p2), 0, %v375_v5  ;;  %v380_v9 = vsub.s32 (!%p216_p2), 1, %v375_v5  ;;  %v611_v10 = vsel (!%p216_p2), %vm366_vm0, 1, %v1844_v3  ;;  %v373_v12 = vsel (!%p216_p2), %vm365_vm1, 1, %v1844_v3  ;;  %s1851_s25 = smov (!%p216_p2), 16   ;;  %s1852_s26 = smov (!%p216_p2), 112  }
   0xa   : > { %v392_v18 = vsub.s32 (!%p216_p2), 4, %v375_v5  ;;  %p250_p3 = scmp.lt.s32.totalorder (!%p216_p2), %s1609_s22, 1  ;;  %vm636_vm14 = vcmask (!%p216_p2), 924672   ;;  %vm680_vm0 = vcmask (!%p216_p2), 121856  }
   0xb   : > { %327 = vperm.xlu1 (!%p216_p2), %1787, %v317_v6   ;;  %295 = vperm.xlu0 (!%p216_p2), %1786, %v285_v7   ;;  %v615_v14 = vrot.slane (!%p216_p2), %v611_v10, %v376_v8  ;;  %v619_v15 = vrot.slane (!%p216_p2), %v611_v10, %v380_v9  ;;  %v377_v16 = vrot.slane (!%p216_p2), %v373_v12, %v376_v8 }
   0xc   : > { %v381_v17 = vrot.slane (!%p216_p2), %v373_v12, %v380_v9 }
   0xd   : > { %vm620_vm2 = vcmp.eq.s32.totalorder %v615_v14, 1  ;;  %vm621_vm3 = vcmp.eq.s32.totalorder %v619_v15, 1  ;;  %vm382_vm4 = vcmp.eq.s32.totalorder %v377_v16, 1  ;;  %s2224_s22 = smov (!%p250_p3, %s1609_s22), 1 }
   0xe   : > { %vm622_vm5 = vmpackc.low %vm621_vm3, %vm620_vm2  ;;  %vm383_vm6 = vcmp.eq.s32.totalorder %v381_v17, 1  ;;  %s1959_s27 = sshll.u32 %s2224_s22, 5  ;;  %v1819_v17 = vld [vmem:[%s2218_s2 + $0x40] sm:$0xff]  }
   0xf   : > { %305 = vperm.xlu1 %1787, %v287_v11   ;;  %300 = vperm.xlu0 %1786, %v286_v13   ;;  %vm384_vm7 = vmpackc.low %vm383_vm6, %vm382_vm4  ;;  %v623_v21 = vsel %vm622_vm5, 65537, %v1844_v3  ;;  %s254_s30 = scalar_lea.vmem %s2216_s0, %s1959_s27  ;;  %vm760_vm5 = vcmask 1039360   ;;  %s264_s28 = scalar_lea.vmem %s2222_s6, %s1959_s27 }
  0x10   : > { %v385_v22 = vsel %vm384_vm7, 65537, %v1844_v3  ;;  %v631_v23 = vrot.slane %v623_v21, %v392_v18  ;;  %v627_v24 = vrot.slane %v623_v21, %v376_v8  ;;  %v272_v27 = vld [vmem:[%s254_s30] sm:$0xff]  ;;  %v273_v30 = vld [vmem:[%s254_s30 + $0x8] sm:$0xff]  ;;  %v275_v37 = vld [vmem:[%s254_s30 + $0x18] sm:$0xff]  ;;  %vm543_vm7 = vcmask 138240  }
  0x11   : > { %v393_v25 = vrot.slane %v385_v22, %v392_v18  ;;  %v389_v26 = vrot.slane %v385_v22, %v376_v8  ;;  %v276_v28 = vunpack.c.l.bf16 %v272_v27  ;;  %v277_v29 = vunpack.c.h.bf16 %v272_v27  ;;  %v274_v40 = vld [vmem:[%s254_s30 + $0x10] sm:$0xff] }
  0x12   : > { %v278_v35 = vunpack.c.l.bf16 %v273_v30  ;;  %v279_v36 = vunpack.c.h.bf16 %v273_v30  ;;  %v282_v45 = vunpack.c.l.bf16 %v275_v37  ;;  %v283_v46 = vunpack.c.h.bf16 %v275_v37 }
  0x13   : > { %337 = vperm.xlu1 %1787, %v319_v19   ;;  %332 = vperm.xlu0 %1786, %v318_v20   ;;  %v280_v49 = vunpack.c.l.bf16 %v274_v40  ;;  %v281_v50 = vunpack.c.h.bf16 %v274_v40 }
  0x17   : > { %970 = vrot.lane.b32.xlu1 %v631_v23, %s1845_s17  ;;  %968 = vrot.lane.b32.xlu0 %v627_v24, %s1845_s17 }
  0x1b   : > { %396 = vrot.lane.b32.xlu1 %v393_v25, %s1846_s18  ;;  %394 = vrot.lane.b32.xlu0 %v389_v26, %s1846_s18 }
  0x1f   : > { %1092 = vrot.lane.b32.xlu1 %v393_v25, %s1847_s19  ;;  %1090 = vrot.lane.b32.xlu0 %v389_v26, %s1847_s19 }
  0x23   : > { %634 = vrot.lane.b32.xlu1 %v631_v23, %s1848_s20  ;;  %632 = vrot.lane.b32.xlu0 %v627_v24, %s1848_s20 }
  0x27   : > { %758 = vrot.lane.b32.xlu1 %v393_v25, %s1849_s23  ;;  %756 = vrot.lane.b32.xlu0 %v389_v26, %s1849_s23 }
  0x2b   : > { %1323 = vrot.lane.b32.xlu1 %v631_v23, %s1850_s24  ;;  %1321 = vrot.lane.b32.xlu0 %v627_v24, %s1850_s24 }
  0x2f   : > { %1789 = vrot.lane.b32.xlu0 %v1844_v3, %s1851_s25  ;;  %1799 = vrot.lane.b32.xlu1 %v1844_v3, %s1850_s24 }
  0x33   : > { %1794 = vrot.lane.b32.xlu0 %v1844_v3, %s1849_s23  ;;  %1809 = vrot.lane.b32.xlu1 %v1844_v3, %s1847_s19 }
  0x37   : > { %1804 = vrot.lane.b32.xlu0 %v1844_v3, %s1848_s20 }
  0x3b   : > { %1814 = vrot.lane.b32.xlu0 %v1844_v3, %s1852_s26 }
  0x86   : > { %v323_v31 = vpop.permute.xlu1 %322  ;;  %v291_v32 = vpop.permute.xlu0 %290 }
  0x87   : > { %v308_v33 = vmul.f32 %v291_v32, %v276_v28  ;;  %v309_v34 = vmul.f32 %v291_v32, %v277_v29 }
  0x89   : > { %v340_v41 = vadd.f32 %v323_v31, %v308_v33  ;;  %v341_v42 = vadd.f32 %v323_v31, %v309_v34 }
  0x8a   : > { %v328_v38 = vpop.permute.xlu1 %327  ;;  %v296_v39 = vpop.permute.xlu0 %295 }
  0x8b   : > { %v310_v43 = vmul.f32 %v296_v39, %v278_v35  ;;  %v311_v44 = vmul.f32 %v296_v39, %v279_v36  ;;  %v348_v53 = vmax.f32 %v340_v41, 0.0  ;;  %v349_v54 = vmax.f32 %v341_v42, 0.0 }
  0x8d   : > { %v342_v47 = vadd.f32 %v328_v38, %v310_v43  ;;  %v343_v48 = vadd.f32 %v328_v38, %v311_v44 }
  0x8e   : > { %v306_v51 = vpop.permute.xlu1 %305  ;;  %v301_v52 = vpop.permute.xlu0 %300 }
  0x8f   : > { %v350_v55 = vmax.f32 %v342_v47, 0.0  ;;  %v351_v56 = vmax.f32 %v343_v48, 0.0  ;;  %v314_v57 = vmul.f32 %v306_v51, %v282_v45  ;;  %v315_v58 = vmul.f32 %v306_v51, %v283_v46 }
  0x90   : > { %v312_v61 = vmul.f32 %v301_v52, %v280_v49  ;;  %v313_v62 = vmul.f32 %v301_v52, %v281_v50 }
  0x91   : > { %v1965_v59 = vpack.c.bf16 %v350_v55, %v348_v53  ;;  %v1967_v60 = vpack.c.bf16 %v351_v56, %v349_v54 }
  0x92   : > { %v338_v63 = vpop.permute.xlu1 %337  ;;  %v333_v0 = vpop.permute.xlu0 %332 }
  0x93   : > { %v346_v1 = vadd.f32 %v338_v63, %v314_v57  ;;  %v347_v2 = vadd.f32 %v338_v63, %v315_v58  ;;  %v344_v4 = vadd.f32 %v333_v0, %v312_v61  ;;  %v345_v5 = vadd.f32 %v333_v0, %v313_v62  ;;  %438 = vrot.lane.b32.xlu1 %v1967_v60, %s1851_s25 }
  0x94   : > { %901 = vmatprep.subr.bf16.mxu0 %v1967_v60  ;;  %436 = vrot.lane.b32.xlu0 %v1965_v59, %s1851_s25 }
  0x95   : > { %v354_v6 = vmax.f32 %v346_v1, 0.0  ;;  %v355_v7 = vmax.f32 %v347_v2, 0.0  ;;  %v352_v8 = vmax.f32 %v344_v4, 0.0  ;;  %v353_v9 = vmax.f32 %v345_v5, 0.0  ;;  %902 = vmatpush1.bf16.msra.mxu0 %v1965_v59 }
  0x96   : > { %v971_v10 = vpop.permute.xlu1 %970  ;;  %v969_v11 = vpop.permute.xlu0 %968 }
  0x97   : > { %v1975_v12 = vpack.c.bf16 %v354_v6, %v352_v8  ;;  %v1977_v13 = vpack.c.bf16 %v355_v7, %v353_v9  ;;  %v972_v14 = vsel %vm804_vm8, %v969_v11, %v971_v10  ;;  %vm973_vm13 = vcmp.ne.s16.totalorder %v969_v11, 0  ;;  %v1818_v10 = vld [vmem:[%s2218_s2 + $0x10] sm:$0xff]  }
  0x98   : > { %vm974_vm12 = vcmp.ne.s16.totalorder %v972_v14, 0  ;;  %v976_v26 = vsel %vm973_vm13, %v1965_v59, 0 }
  0x99   : > { %442 = vrot.lane.b32.xlu1 %v1975_v12, %s1851_s25  ;;  %444 = vrot.lane.b32.xlu0 %v1977_v13, %s1851_s25  ;;  %v977_v22 = vsel %vm974_vm12, %v1967_v60, 0  ;;  %v980_v23 = vsel %vm974_vm12, %v1977_v13, 0  ;;  %v979_v27 = vsel %vm973_vm13, %v1975_v12, 0 }
  0x9a   : > { %903 = vmatprep.subr.bf16.mxu0 %v1977_v13  ;;  %v397_v15 = vpop.permute.xlu1 %396  ;;  %v395_v16 = vpop.permute.xlu0 %394 }
  0x9b   : > { %v399_v18 = vsel %vm398_vm9, %v395_v16, %v397_v15  ;;  %904 = vmatpush1.bf16.msra.mxu0 %v1975_v12  ;;  %vm402_vm15 = vcmp.ne.s16.totalorder %v397_v15, 0 }
  0x9c   : > { %vm401_vm11 = vcmp.ne.s16.totalorder %v399_v18, 0  ;;  %v405_v29 = vsel %vm402_vm15, %v1967_v60, 0  ;;  %v408_v30 = vsel %vm402_vm15, %v1977_v13, 0  ;;  %vm446_vm15 = vcmask 130048  }
  0x9d   : > { %1235 = vrot.lane.b32.xlu1 %v1967_v60, %s1852_s26  ;;  %v404_v19 = vsel %vm401_vm11, %v1965_v59, 0  ;;  %v407_v32 = vsel %vm401_vm11, %v1975_v12, 0 }
  0x9e   : > { %v1093_v20 = vpop.permute.xlu1 %1092  ;;  %v1091_v21 = vpop.permute.xlu0 %1090  ;;  %533 = vrot.lane.b32.xlu0 %v404_v19, %s1850_s24  ;;  %1654 = vmatmul.mubr.msk.bf16.vlgmr.msra.gmra.mrb[0].mxu0 %vm455_vm10, %v1819_v17  ;;  %v1820_v19 = vld [vmem:[%s2218_s2 + $0x18] sm:$0xff]  }
  0x9f   : > { %1061 = vmatprep.mubr.bf16.mxu0 %v1844_v3  ;;  %v1094_v31 = vsel %vm680_vm0, %v1091_v21, %v1093_v20  ;;  %vm1095_vm3 = vcmp.ne.s16.totalorder %v1091_v21, 0 }
  0xa0   : > { %vm1096_vm2 = vcmp.ne.s16.totalorder %v1094_v31, 0  ;;  %v1098_v36 = vsel %vm1095_vm3, %v1965_v59, 0  ;;  %v1101_v37 = vsel %vm1095_vm3, %v1975_v12, 0 }
  0xa1   : > { %1005 = vrot.lane.b32.xlu1 %v977_v22, %s1849_s23  ;;  %v1099_v34 = vsel %vm1096_vm2, %v1967_v60, 0  ;;  %v1102_v35 = vsel %vm1096_vm2, %v1977_v13, 0 }
  0xa2   : > { %1011 = vrot.lane.b32.xlu0 %v980_v23, %s1849_s23  ;;  %v635_v24 = vpop.permute.xlu1 %634  ;;  %v633_v25 = vpop.permute.xlu0 %632 }
  0xa3   : > { %v637_v28 = vsel %vm636_vm14, %v633_v25, %v635_v24  ;;  %vm640_vm4 = vcmp.ne.s16.totalorder %v635_v24, 0 }
  0xa4   : > { %vm639_vm1 = vcmp.ne.s16.totalorder %v637_v28, 0  ;;  %v643_v38 = vsel %vm640_vm4, %v1967_v60, 0  ;;  %v646_v39 = vsel %vm640_vm4, %v1977_v13, 0 }
  0xa5   : > { %1003 = vrot.lane.b32.xlu1 %v976_v26, %s1849_s23  ;;  %v642_v33 = vsel %vm639_vm1, %v1965_v59, 0  ;;  %v645_v42 = vsel %vm639_vm1, %v1975_v12, 0  ;;  %vm1245_vm1 = vcmask 916480  }
  0xa6   : > { %1009 = vrot.lane.b32.xlu0 %v979_v27, %s1849_s23  ;;  %v759_v40 = vpop.permute.xlu1 %758  ;;  %v757_v41 = vpop.permute.xlu0 %756 }
  0xa7   : > { %v761_v43 = vsel %vm760_vm5, %v757_v41, %v759_v40  ;;  %vm764_vm11 = vcmp.ne.s16.totalorder %v759_v40, 0 }
  0xa8   : > { %vm763_vm6 = vcmp.ne.s16.totalorder %v761_v43, 0  ;;  %v767_v48 = vsel %vm764_vm11, %v1967_v60, 0  ;;  %v770_v49 = vsel %vm764_vm11, %v1977_v13, 0 }
  0xa9   : > { %535 = vrot.lane.b32.xlu1 %v405_v29, %s1850_s24  ;;  %v766_v46 = vsel %vm763_vm6, %v1965_v59, 0  ;;  %v769_v50 = vsel %vm763_vm6, %v1975_v12, 0 }
  0xaa   : > { %541 = vrot.lane.b32.xlu0 %v408_v30, %s1850_s24  ;;  %v1324_v44 = vpop.permute.xlu1 %1323  ;;  %v1322_v45 = vpop.permute.xlu0 %1321  ;;  %v1821_v30 = vld [vmem:[%s2218_s2 + $0x50] sm:$0xff]  }
  0xab   : > { %v1325_v47 = vsel %vm543_vm7, %v1322_v45, %v1324_v44  ;;  %vm1326_vm13 = vcmp.ne.s16.totalorder %v1322_v45, 0 }
  0xac   : > { %vm1327_vm12 = vcmp.ne.s16.totalorder %v1325_v47, 0  ;;  %v1329_v52 = vsel %vm1326_vm13, %v1965_v59, 0  ;;  %v1332_v54 = vsel %vm1326_vm13, %v1975_v12, 0 }
  0xad   : > { %539 = vrot.lane.b32.xlu1 %v407_v32, %s1850_s24  ;;  %v1330_v51 = vsel %vm1327_vm12, %v1967_v60, 0  ;;  %v1333_v53 = vsel %vm1327_vm12, %v1977_v13, 0  ;;  %s2199_s24 = scalar_lea.vmem %s2221_s5, %s1959_s27 }
  0xae   : > { %670 = vrot.lane.b32.xlu0 %v642_v33, %s1847_s19  ;;  %v1790_v55 = vpop.permute.xlu0 %1789  ;;  %v1800_v57 = vpop.permute.xlu1 %1799 }
  0xaf   : > { %v1791_v63 = vunpack.i.l.bf16 %v1790_v55  ;;  %v1792_v5 = vunpack.i.h.bf16 %v1790_v55  ;;  %v1801_v25 = vunpack.i.l.bf16 %v1800_v57  ;;  %v1802_v32 = vunpack.i.h.bf16 %v1800_v57  ;;  %v1825_v55 = vld [vmem:[%s2218_s2 + $0x60] sm:$0xff]  }
  0xb1   : > { %1127 = vrot.lane.b32.xlu1 %v1099_v34, %s1848_s20 }
  0xb2   : > { %1133 = vrot.lane.b32.xlu0 %v1102_v35, %s1848_s20  ;;  %v1795_v56 = vpop.permute.xlu0 %1794  ;;  %v2066_v61 = vpop.permute.xlu1 %1809 }
  0xb3   : > { %v1796_v15 = vunpack.i.l.bf16 %v1795_v56  ;;  %v1797_v20 = vunpack.i.h.bf16 %v1795_v56 }
  0xb5   : > { %1125 = vrot.lane.b32.xlu1 %v1098_v36, %s1848_s20 }
  0xb6   : > { %1131 = vrot.lane.b32.xlu0 %v1101_v37, %s1848_s20  ;;  %v2064_v58 = vpop.permute.xlu0 %1804  ;;  %v1822_v37 = vld [vmem:[%s2218_s2] sm:$0xff]  }
  0xb7   : > { %v1807_v43 = vunpack.i.h.bf16 %v2064_v58 }
  0xb9   : > { %672 = vrot.lane.b32.xlu1 %v643_v38, %s1847_s19  ;;  %v1806_v38 = vunpack.i.l.bf16 %v2064_v58  ;;  %v1812_v58 = vunpack.i.h.bf16 %v2066_v61 }
  0xba   : > { %678 = vrot.lane.b32.xlu0 %v646_v39, %s1847_s19  ;;  %v2068_v62 = vpop.permute.xlu0 %1814 }
  0xbd   : > { %676 = vrot.lane.b32.xlu1 %v645_v42, %s1847_s19  ;;  %v1823_v42 = vld [vmem:[%s2218_s2 + $0x58] sm:$0xff]  }
  0xbe   : > { %1241 = vrot.lane.b32.xlu0 %v1977_v13, %s1852_s26 }
  0xc1   : > { %1233 = vrot.lane.b32.xlu1 %v1965_v59, %s1852_s26 }
  0xc2   : > { %1239 = vrot.lane.b32.xlu0 %v1975_v12, %s1852_s26 }
  0xc5   : > { %792 = vrot.lane.b32.xlu1 %v1844_v3, %s1845_s17 }
  0xc6   : > { %794 = vrot.lane.b32.xlu0 %v766_v46, %s1845_s17 }
  0xc9   : > { %796 = vrot.lane.b32.xlu1 %v767_v48, %s1845_s17  ;;  %v1811_v48 = vunpack.i.l.bf16 %v2066_v61  ;;  %v1817_v61 = vunpack.i.h.bf16 %v2068_v62 }
  0xca   : > { %802 = vrot.lane.b32.xlu0 %v770_v49, %s1845_s17  ;;  %v1816_v49 = vunpack.i.l.bf16 %v2068_v62 }
  0xcd   : > { %800 = vrot.lane.b32.xlu1 %v769_v50, %s1845_s17 }
  0xce   : > { %1358 = vrot.lane.b32.xlu0 %v1330_v51, %s1846_s18  ;;  %v1824_v51 = vld [vmem:[%s2218_s2 + $0x8] sm:$0xff]  }
  0xd1   : > { %798 = vrot.lane.b32.xlu1 %v1844_v3, %s1845_s17 }
  0xd2   : > { %1356 = vrot.lane.b32.xlu0 %v1329_v52, %s1846_s18 }
  0xd5   : > { %1360 = vrot.lane.b32.xlu1 %v1844_v3, %s1846_s18 }
  0xd6   : > { %1366 = vrot.lane.b32.xlu0 %v1844_v3, %s1846_s18 }
  0xd9   : > { %1364 = vrot.lane.b32.xlu1 %v1333_v53, %s1846_s18 }
  0xdd   : > { %1362 = vrot.lane.b32.xlu1 %v1332_v54, %s1846_s18 }
 0x105   : > { %v439_v0 = vpop.permute.xlu1 %438 }
 0x106   : > { %v437_v1 = vpop.permute.xlu0 %436 }
 0x107   : > { %v448_v2 = vsel %vm446_vm15, %v437_v1, %v439_v0  ;;  %v447_v4 = vsel %vm446_vm15, %v1791_v63, %v437_v1 }
 0x108   : > { %462 = vmatprep.subr.bf16.mxu1 %v448_v2 }
 0x109   : > { %463 = vmatpush1.bf16.msra.mxu1 %v447_v4 }
 0x10b   : > { %v443_v6 = vpop.permute.xlu1 %442  ;;  %v445_v7 = vpop.permute.xlu0 %444 }
 0x10c   : > { %v450_v8 = vsel %vm446_vm15, %v443_v6, %v445_v7  ;;  %v449_v9 = vsel %vm446_vm15, %v1792_v5, %v443_v6  ;;  %v1826_v5 = vld [vmem:[%s2218_s2 + $0x20] sm:$0xff]  }
 0x10d   : > { %464 = vmatprep.subr.bf16.mxu1 %v450_v8  ;;  %v1827_v8 = vld [vmem:[%s2218_s2 + $0x68] sm:$0xff]  }
 0x10e   : > { %465 = vmatpush1.bf16.msra.mxu1 %v449_v9 }
 0x10f   : > { %v2073_v11 = vpop.permute.xlu1 %1235 }
 0x110   : > { %v534_v14 = vpop.permute.xlu0 %533  ;;  %v1247_v57 = vsel %vm1245_vm1, %v2073_v11, %v1816_v49 }
 0x111   : > { %1626 = vmatmul.mubr.msk.bf16.vlgmr.msra.gmra.mrb[0].mxu1 %vm455_vm10, %v1818_v10  ;;  %v544_v31 = vsel %vm543_vm7, %v1801_v25, %v534_v14  ;;  %v1830_v25 = vld [vmem:[%s2218_s2 + $0x30] sm:$0xff]  }
 0x112   : > { %504 = vmatprep.mubr.bf16.mxu1 %v1844_v3 }
 0x113   : > { %v1006_v16 = vpop.permute.xlu1 %1005 }
 0x114   : > { %v1012_v17 = vpop.permute.xlu0 %1011  ;;  %v1016_v18 = vsel %vm760_vm5, %v1006_v16, %v1796_v15  ;;  %v1828_v15 = vld [vmem:[%s2218_s2 + $0x28] sm:$0xff]  }
 0x115   : > { %1029 = vmatprep.subr.bf16.mxu0 %v1016_v18  ;;  %v1018_v24 = vsel %vm760_vm5, %v1012_v17, %v1797_v20  ;;  %v1829_v18 = vld [vmem:[%s2218_s2 + $0x70] sm:$0xff]  }
 0x117   : > { %v1004_v21 = vpop.permute.xlu1 %1003 }
 0x118   : > { %v1015_v22 = vsel %vm760_vm5, %v1004_v21, %v1006_v16  ;;  %v1010_v23 = vpop.permute.xlu0 %1009 }
 0x119   : > { %1030 = vmatpush1.bf16.msra.mxu0 %v1015_v22  ;;  %1627 = vmatmul.mubr.msk.bf16.gmra.mrb[4].mxu1 %vm455_vm10, %v1820_v19  ;;  %v1017_v27 = vsel %vm760_vm5, %v1010_v23, %v1012_v17 }
 0x11a   : > { %1031 = vmatprep.subr.bf16.mxu0 %v1018_v24  ;;  %590 = vmatprep.mubr.bf16.mxu1 %v1844_v3 }
 0x11b   : > { %v536_v26 = vpop.permute.xlu1 %535 }
 0x11c   : > { %v542_v28 = vpop.permute.xlu0 %541  ;;  %v545_v29 = vsel %vm543_vm7, %v534_v14, %v536_v26  ;;  %v1831_v26 = vld [vmem:[%s2218_s2 + $0x78] sm:$0xff]  }
 0x11d   : > { %558 = vmatprep.subr.bf16.mxu1 %v545_v29  ;;  %1032 = vmatpush1.bf16.msra.mxu0 %v1017_v27 }
 0x11e   : > { %559 = vmatpush1.bf16.msra.mxu1 %v544_v31 }
 0x11f   : > { %v540_v33 = vpop.permute.xlu1 %539 }
 0x120   : > { %v546_v34 = vsel %vm543_vm7, %v1802_v32, %v540_v33  ;;  %v671_v35 = vpop.permute.xlu0 %670  ;;  %v547_v36 = vsel %vm543_vm7, %v540_v33, %v542_v28  ;;  %1662 = vmatmul.mubr.msk.bf16.vlgmr.msra.gmra.mrb[0].mxu0 %vm455_vm10, %v1821_v30  ;;  %v1832_v33 = vld [vmem:[%s2218_s2 + $0x38] sm:$0xff]  }
 0x121   : > { %560 = vmatprep.subr.bf16.mxu1 %v547_v36  ;;  %1071 = vmatprep.mubr.bf16.mxu0 %v1844_v3  ;;  %v681_v56 = vsel %vm680_vm0, %v1811_v48, %v671_v35 }
 0x122   : > { %561 = vmatpush1.bf16.msra.mxu1 %v546_v34 }
 0x123   : > { %v1128_v39 = vpop.permute.xlu1 %1127 }
 0x124   : > { %v1134_v40 = vpop.permute.xlu0 %1133  ;;  %v1138_v41 = vsel %vm636_vm14, %v1128_v39, %v1806_v38 }
 0x125   : > { %1151 = vmatprep.subr.bf16.mxu0 %v1138_v41  ;;  %1630 = vmatmul.mubr.msk.bf16.vlgmr.msra.gmra.mrb[0].mxu1 %vm455_vm10, %v1822_v37  ;;  %v1140_v47 = vsel %vm636_vm14, %v1134_v40, %v1807_v43 }
 0x126   : > { %600 = vmatprep.mubr.bf16.mxu1 %v1844_v3 }
 0x127   : > { %v1126_v44 = vpop.permute.xlu1 %1125 }
 0x128   : > { %v1137_v45 = vsel %vm636_vm14, %v1126_v44, %v1128_v39  ;;  %v1132_v46 = vpop.permute.xlu0 %1131  ;;  %1663 = vmatmul.mubr.msk.bf16.gmra.mrb[4].mxu0 %vm455_vm10, %v1823_v42 }
 0x129   : > { %1152 = vmatpush1.bf16.msra.mxu0 %v1137_v45  ;;  %1183 = vmatprep.mubr.bf16.mxu0 %v1844_v3  ;;  %v1139_v52 = vsel %vm636_vm14, %v1132_v46, %v1134_v40 }
 0x12a   : > { %1153 = vmatprep.subr.bf16.mxu0 %v1140_v47 }
 0x12b   : > { %v673_v50 = vpop.permute.xlu1 %672 }
 0x12c   : > { %v679_v53 = vpop.permute.xlu0 %678  ;;  %v682_v54 = vsel %vm680_vm0, %v671_v35, %v673_v50  ;;  %v1835_v35 = vld [vmem:[%s2218_s2 + $0x88] sm:$0xff]  }
 0x12d   : > { %695 = vmatprep.subr.bf16.mxu1 %v682_v54  ;;  %1154 = vmatpush1.bf16.msra.mxu0 %v1139_v52 }
 0x12e   : > { %696 = vmatpush1.bf16.msra.mxu1 %v681_v56  ;;  %1260 = vmatprep.subr.bf16.mxu0 %v1247_v57 }
 0x12f   : > { %v677_v63 = vpop.permute.xlu1 %676  ;;  %1631 = vmatmul.mubr.msk.bf16.gmra.mrb[4].mxu1 %vm455_vm10, %v1824_v51 }
 0x130   : > { %v683_v0 = vsel %vm680_vm0, %v1812_v58, %v677_v63  ;;  %v1242_v1 = vpop.permute.xlu0 %1241  ;;  %v684_v2 = vsel %vm680_vm0, %v677_v63, %v679_v53  ;;  %1670 = vmatmul.mubr.msk.bf16.vlgmr.msra.gmra.mrb[0].mxu0 %vm455_vm10, %v1825_v55  ;;  %727 = vmatprep.mubr.bf16.mxu1 %v1844_v3 }
 0x131   : > { %697 = vmatprep.subr.bf16.mxu1 %v684_v2  ;;  %1193 = vmatprep.mubr.bf16.mxu0 %v1844_v3  ;;  %v1249_v9 = vsel %vm1245_vm1, %v1242_v1, %v1817_v61 }
 0x132   : > { %698 = vmatpush1.bf16.msra.mxu1 %v683_v0 }
 0x133   : > { %v1234_v4 = vpop.permute.xlu1 %1233 }
 0x134   : > { %v1246_v6 = vsel %vm1245_vm1, %v1234_v4, %v2073_v11  ;;  %v1240_v7 = vpop.permute.xlu0 %1239 }
 0x135   : > { %1261 = vmatpush1.bf16.msra.mxu0 %v1246_v6  ;;  %v1248_v62 = vsel %vm1245_vm1, %v1240_v7, %v1242_v1 }
 0x136   : > { %1262 = vmatprep.subr.bf16.mxu0 %v1249_v9 }
 0x137   : > { %v793_v10 = vpop.permute.xlu1 %792  ;;  %1638 = vmatmul.mubr.msk.bf16.vlgmr.msra.gmra.mrb[0].mxu1 %vm455_vm10, %v1826_v5 }
 0x138   : > { %v795_v14 = vpop.permute.xlu0 %794  ;;  %1671 = vmatmul.mubr.msk.bf16.gmra.mrb[4].mxu0 %vm455_vm10, %v1827_v8  ;;  %737 = vmatprep.mubr.bf16.mxu1 %v1844_v3 }
 0x139   : > { %1263 = vmatpush1.bf16.msra.mxu0 %v1248_v62  ;;  %1292 = vmatprep.mubr.bf16.mxu0 %v1844_v3  ;;  %v805_v19 = vsel %vm804_vm8, %v793_v10, %v795_v14 }
 0x13b   : > { %v797_v11 = vpop.permute.xlu1 %796 }
 0x13c   : > { %v803_v16 = vpop.permute.xlu0 %802  ;;  %v806_v17 = vsel %vm804_vm8, %v795_v14, %v797_v11 }
 0x13d   : > { %819 = vmatprep.subr.bf16.mxu1 %v806_v17 }
 0x13e   : > { %820 = vmatpush1.bf16.msra.mxu1 %v805_v19 }
 0x13f   : > { %v801_v20 = vpop.permute.xlu1 %800  ;;  %1639 = vmatmul.mubr.msk.bf16.gmra.mrb[4].mxu1 %vm455_vm10, %v1828_v15 }
 0x140   : > { %v1359_v21 = vpop.permute.xlu0 %1358  ;;  %v808_v22 = vsel %vm804_vm8, %v801_v20, %v803_v16  ;;  %1678 = vmatmul.mubr.msk.bf16.vlgmr.msra.gmra.mrb[0].mxu0 %vm455_vm10, %v1829_v18  ;;  %851 = vmatprep.mubr.bf16.mxu1 %v1844_v3 }
 0x141   : > { %821 = vmatprep.subr.bf16.mxu1 %v808_v22  ;;  %1302 = vmatprep.mubr.bf16.mxu0 %v1844_v3 }
 0x143   : > { %v799_v23 = vpop.permute.xlu1 %798 }
 0x144   : > { %v807_v24 = vsel %vm804_vm8, %v799_v23, %v801_v20  ;;  %v1357_v27 = vpop.permute.xlu0 %1356 }
 0x145   : > { %822 = vmatpush1.bf16.msra.mxu1 %v807_v24  ;;  %v1368_v30 = vsel %vm398_vm9, %v1357_v27, %v1359_v21 }
 0x146   : > { %1701 = vmatprep.subr.bf16.mxu1 %v1967_v60 }
 0x147   : > { %v1361_v28 = vpop.permute.xlu1 %1360 }
 0x148   : > { %1646 = vmatmul.mubr.msk.bf16.vlgmr.msra.gmra.mrb[0].mxu1 %vm455_vm10, %v1830_v25  ;;  %v1369_v29 = vsel %vm398_vm9, %v1359_v21, %v1361_v28  ;;  %1679 = vmatmul.mubr.msk.bf16.gmra.mrb[4].mxu0 %vm455_vm10, %v1831_v26  ;;  %v1367_v31 = vpop.permute.xlu0 %1366 }
 0x149   : > { %1703 = vmatpush1.bf16.msra.mxu1 %v1965_v59  ;;  %1382 = vmatprep.subr.bf16.mxu0 %v1369_v29 }
 0x14a   : > { %1702 = vmatprep.subr.bf16.mxu1 %v1977_v13  ;;  %1383 = vmatpush1.bf16.msra.mxu0 %v1368_v30  ;;  %v1833_v13 = vld [vmem:[%s2218_s2 + $0x80] sm:$0xff]  }
 0x14b   : > { %v1365_v32 = vpop.permute.xlu1 %1364  ;;  %861 = vmatprep.mubr.bf16.mxu1 %v1844_v3  ;;  %1414 = vmatprep.mubr.bf16.mxu0 %v1844_v3 }
 0x14c   : > { %v1371_v60 = vsel %vm398_vm9, %v1365_v32, %v1367_v31 }
 0x14d   : > { %1704 = vmatpush1.bf16.msra.mxu1 %v1975_v12  ;;  %1384 = vmatprep.subr.bf16.mxu0 %v1371_v60  ;;  %v1834_v12 = vld [vmem:[%s2218_s2 + $0x48] sm:$0xff]  }
 0x14f   : > { %v1363_v59 = vpop.permute.xlu1 %1362 }
 0x150   : > { %v1370_v34 = vsel %vm398_vm9, %v1363_v59, %v1365_v32  ;;  %1647 = vmatmul.mubr.msk.bf16.gmra.mrb[4].mxu1 %vm455_vm10, %v1832_v33  ;;  %vm1516_vm9 = vcmask 15368  }
 0x151   : > { %1385 = vmatpush1.bf16.msra.mxu0 %v1370_v34  ;;  %943 = vmatprep.mubr.bf16.mxu1 %v1844_v3 }
 0x154   : > { %1686 = vmatmul.mubr.msk.bf16.vlgmr.msra.gmra.mrb[0].mxu0 %vm455_vm10, %v1833_v13 }
 0x155   : > { %1424 = vmatprep.mubr.bf16.mxu0 %v1844_v3 }
 0x15c   : > { %1655 = vmatmul.mubr.msk.bf16.vlgmr.msra.gmra.mrb[4].mxu1 %vm455_vm10, %v1834_v12  ;;  %1687 = vmatmul.mubr.msk.bf16.gmra.mrb[4].mxu0 %vm455_vm10, %v1835_v35 }
 0x21b   : > { %v853_v36 = vpop.f32.mrb[0].mxu1 }
 0x21c   : > { %v855_v37 = vpop.f32.mrb[1].mxu1 }
 0x21d   : > { %v857_v38 = vpop.f32.mrb[2].mxu1 }
 0x21e   : > { %v859_v39 = vpop.f32.mrb[3].mxu1 }
 0x227   : > { %v1416_v40 = vpop.f32.mrb[0].mxu0 }
 0x228   : > { %v1705_v41 = vadd.f32 %v1416_v40, %v853_v36  ;;  %v1418_v42 = vpop.f32.mrb[1].mxu0 }
 0x229   : > { %v1706_v3 = vadd.f32 %v1418_v42, %v855_v37  ;;  %v1420_v43 = vpop.f32.mrb[2].mxu0 }
 0x22a   : > { %v1707_v44 = vadd.f32 %v1420_v43, %v857_v38  ;;  %v1422_v45 = vpop.f32.mrb[3].mxu0 }
 0x22b   : > { %v1697_v46 = vpack.c.bf16 %v1706_v3, %v1705_v41  ;;  %v1708_v47 = vadd.f32 %v1422_v45, %v859_v39 }
 0x22c   : > { %v1443_v48 = vpack.c.bf16 %v1707_v44, %v1705_v41 }
 0x22d   : > { %1467 = vst [vmem:[%s2199_s24] sm:$0xff] %v1697_v46  ;;  %v1444_v49 = vpack.c.bf16 %v1708_v47, %v1706_v3  ;;  %v1698_v50 = vpack.c.bf16 %v1708_v47, %v1707_v44 }
 0x22e   : > { %v1473_v51 = vunpack.c.h.bf16 %v1443_v48  ;;  %v1471_v52 = vunpack.c.l.bf16 %v1443_v48 }
 0x22f   : > { %1468 = vst [vmem:[%s2199_s24 + $0x8] sm:$0xff] %v1698_v50  ;;  %v945_v53 = vpop.f32.mrb[4].mxu1  ;;  %v1426_v54 = vpop.f32.mrb[4].mxu0  ;;  %v1474_v55 = vunpack.c.h.bf16 %v1444_v49  ;;  %v1472_v56 = vunpack.c.l.bf16 %v1444_v49 }
 0x230   : > { %v1709_v57 = vadd.f32 %v1426_v54, %v945_v53  ;;  %v947_v58 = vpop.f32.mrb[5].mxu1  ;;  %v1428_v63 = vpop.f32.mrb[5].mxu0  ;;  %v1496_v0 = vmul.f32 %v1471_v52, %v1471_v52  ;;  %v1498_v1 = vmul.f32 %v1473_v51, %v1473_v51 }
 0x231   : > { %v1710_v2 = vadd.f32 %v1428_v63, %v947_v58  ;;  %v949_v61 = vpop.f32.mrb[6].mxu1  ;;  %v1430_v4 = vpop.f32.mrb[6].mxu0  ;;  %v1482_v5 = vadd.f32 %v1474_v55, %v1473_v51  ;;  %v1479_v6 = vadd.f32 %v1472_v56, %v1471_v52  ;;  %v1497_v7 = vmul.f32 %v1472_v56, %v1472_v56 }
 0x232   : > { %v1711_v8 = vadd.f32 %v1430_v4, %v949_v61  ;;  %v951_v9 = vpop.f32.mrb[7].mxu1  ;;  %v1432_v10 = vpop.f32.mrb[7].mxu0  ;;  %v1499_v62 = vmul.f32 %v1474_v55, %v1474_v55 }
 0x233   : > { %v1699_v14 = vpack.c.bf16 %v1710_v2, %v1709_v57  ;;  %v1712_v11 = vadd.f32 %v1432_v10, %v951_v9  ;;  %1483 = vadd.xlane.f32.xlu1 %v1482_v5  ;;  %1480 = vadd.xlane.f32.xlu0 %v1479_v6  ;;  %v1504_v15 = vadd.f32 %v1497_v7, %v1496_v0 }
 0x234   : > { %v1445_v16 = vpack.c.bf16 %v1711_v8, %v1709_v57  ;;  %v1507_v17 = vadd.f32 %v1499_v62, %v1498_v1 }
 0x235   : > { %1469 = vst [vmem:[%s2199_s24 + $0x10] sm:$0xff] %v1699_v14  ;;  %v1446_v18 = vpack.c.bf16 %v1712_v11, %v1710_v2  ;;  %v1700_v19 = vpack.c.bf16 %v1712_v11, %v1711_v8 }
 0x236   : > { %v1475_v20 = vunpack.c.l.bf16 %v1445_v16  ;;  %v1477_v21 = vunpack.c.h.bf16 %v1445_v16 }
 0x237   : > { %1470 = vst [vmem:[%s2199_s24 + $0x18] sm:$0xff] %v1700_v19  ;;  %1505 = vadd.xlane.f32.xlu1 %v1504_v15  ;;  %1508 = vadd.xlane.f32.xlu0 %v1507_v17  ;;  %v1476_v22 = vunpack.c.l.bf16 %v1446_v18  ;;  %v1478_v23 = vunpack.c.h.bf16 %v1446_v18 }
 0x238   : > { %v1500_v24 = vmul.f32 %v1475_v20, %v1475_v20  ;;  %v1502_v25 = vmul.f32 %v1477_v21, %v1477_v21 }
 0x239   : > { %v1485_v26 = vadd.f32 %v1476_v22, %v1475_v20  ;;  %v1501_v27 = vmul.f32 %v1476_v22, %v1476_v22  ;;  %v1488_v28 = vadd.f32 %v1478_v23, %v1477_v21  ;;  %v1503_v29 = vmul.f32 %v1478_v23, %v1478_v23 }
 0x23b   : > { %1486 = vadd.xlane.f32.xlu0 %v1485_v26  ;;  %v1510_v30 = vadd.f32 %v1501_v27, %v1500_v24  ;;  %v1513_v31 = vadd.f32 %v1503_v29, %v1502_v25 }
 0x23d   : > { %1511 = vadd.xlane.f32.xlu1 %v1510_v30 }
 0x23f   : > { %1489 = vadd.xlane.f32.xlu0 %v1488_v28 }
 0x243   : > { %1514 = vadd.xlane.f32.xlu0 %v1513_v31 }
 0x2c0   : > { %v1484_v32 = vpop.xlane.xlu1 %1483  ;;  %v1481_v60 = vpop.xlane.xlu0 %1480 }
 0x2c1   : > { %1493 = vst.msk [vmem:[%s264_s28 + $0x8] sm:$0xff] %vm804_vm8, %v1484_v32  ;;  %1492 = vst.msk [vmem:[%s264_s28] sm:$0xff] %vm804_vm8, %v1481_v60 }
 0x2c4   : > { %v1506_v33 = vpop.xlane.xlu1 %1505  ;;  %v1509_v59 = vpop.xlane.xlu0 %1508 }
 0x2c5   : > { %1517 = vst.msk [vmem:[%s264_s28] sm:$0xff] %vm1516_vm9, %v1506_v33  ;;  %1518 = vst.msk [vmem:[%s264_s28 + $0x8] sm:$0xff] %vm1516_vm9, %v1509_v59 }
 0x2c8   : > { %v1487_v34 = vpop.xlane.xlu0 %1486 }
 0x2c9   : > { %1494 = vst.msk [vmem:[%s264_s28 + $0x10] sm:$0xff] %vm804_vm8, %v1487_v34 }
 0x2ca   : > { %v1512_v13 = vpop.xlane.xlu1 %1511 }
 0x2cb   : > { %1519 = vst.msk [vmem:[%s264_s28 + $0x10] sm:$0xff] %vm1516_vm9, %v1512_v13 }
 0x2cc   : > { %v1490_v12 = vpop.xlane.xlu0 %1489 }
 0x2cd   : > { %1495 = vst.msk [vmem:[%s264_s28 + $0x18] sm:$0xff] %vm804_vm8, %v1490_v12 }
 0x2d0   : > { %v1515_v35 = vpop.xlane.xlu0 %1514 }
 0x2d1   : > { %1520 = vst.msk [vmem:[%s264_s28 + $0x18] sm:$0xff] %vm1516_vm9, %v1515_v35 }
 0x2d2 PF: > { %s17_s21 = sadd.s32 1, %s1842_s21  }
 0x2d3   : > { %p14_p4 = scmp.ge.s32.totalorder %s17_s21, 4  }
 0x2d5   :  { %16 = sbr.rel (!%p14_p4) target bundleno = 1 (0x1), region = 90 }

// kernel: residual_block3_pallas.7
= control target key start
LH: loop header
LB: loop body
LE: loop exit
PB: predicated region body
PF: predicated region fallthrough
CT: control target
= control target key end

     0   :  { %s1124_s24 = smov 0   ;;  %s1126_s25 = smov 0   ;;  %s1330_s0 = inlined_call_operand.vmem [shape: bf16[2,32,256], index: 0, kind: input, shape index: {}]   ;;  %s1331_s1 = inlined_call_operand.vmem [shape: f32[2,64,256], index: 1, kind: input, shape index: {}]   ;;  %s1332_s2 = inlined_call_operand.vmem [shape: bf16[64,32], index: 2, kind: input, shape index: {}]   ;;  %s1333_s3 = inlined_call_operand.vmem [shape: f32[32,1], index: 3, kind: input, shape index: {}]   ;;  %s1334_s4 = inlined_call_operand.vmem [shape: f32[32,1], index: 4, kind: input, shape index: {}]   ;;  %s1335_s5 = inlined_call_operand.vmem [shape: f32[64,1], index: 5, kind: input, shape index: {}]   ;;  %s1336_s6 = inlined_call_operand.vmem [shape: f32[64,1], index: 6, kind: input, shape index: {}]   ;;  %s1337_s7 = inlined_call_operand.vmem [shape: f32[2,64,256], index: 7, kind: output, shape index: {}]  }
   0x1   :  { %s1128_s26 = smov 0   ;;  %s1130_s27 = smov 0  }
   0x2   :  { %s1132_s28 = smov 0   ;;  %s1134_s29 = smov 0  }
   0x3   :  { %s1136_s30 = smov 0  }
   0x4 LB: > { %s26_s8 = sadd.s32 1, %s1073_s28  ;;  %s29_s9 = sadd.s32 1, %s1077_s29  ;;  %s1081_s30 = sphi %s1136_s30, %s17_s30   ;;  %s1077_s29 = sphi %s1134_s29, %s1345_s29   ;;  %s1073_s28 = sphi %s1132_s28, %s1344_s28   ;;  %s1069_s27 = sphi %s1130_s27, %s1343_s27   ;;  %s1065_s26 = sphi %s1128_s26, %s1342_s26   ;;  %s1061_s25 = sphi %s1126_s25, %s1341_s25   ;;  %s1057_s24 = sphi %s1124_s24, %s1340_s24  }
   0x5   : > { %p27_p0 = scmp.ge.s32.totalorder %s26_s8, 2  ;;  %s906_s10 = sadd.s32 4294967295, %s1081_s30  }
   0x6   : > { %p45_p1 = scmp.ne.s32.totalorder %s1061_s25, %s1057_s24  ;;  %p46_p2 = scmp.eq.s32.totalorder %s1081_s30, 0 }
   0x7   : > { %s1347_s8 = smov (%p27_p0, %s26_s8), 0  ;;  %s1349_s9 = smov (!%p27_p0, %s29_s9), %s1077_s29 }
   0x8   : > { %p31_p3 = scmp.ge.s32.totalorder %s1349_s9, 2  ;;  %p210_p4 = scmp.eq.s32.totalorder %s906_s10, 3 }
   0x9   : > { %s34_s11 = ssub.s32 %s1073_s28, %s1347_s8  ;;  %p1170_p5 = por %p46_p2, %p45_p1 }
   0xa   : > { %s1351_s9 = smov (%p31_p3, %s1349_s9), 0  ;;  %p1176_p6 = por %p210_p4, %p45_p1 }
   0xb   : > { %s33_s14 = ssub.s32 %s1077_s29, %s1351_s9  ;;  %s38_s16 = sadd.s32 1, %s1061_s25 }
   0xc   : > { %s35_s15 = sor.u32 %s34_s11, %s33_s14  ;;  %p909_p8 = scmp.ge.s32.totalorder %s1081_s30, 4 }
   0xd   : > { %p36_p7 = scmp.eq.s32.totalorder %s35_s15, 0 }
   0xe   : > { %247 = sbr.rel (%p909_p8) target bundleno = 39 (0x27), region = 36 }
   0xf   : > { %s1184_s17 = scalar_select %p36_p7, %s1061_s25, %s38_s16  }
  0x15   : > { %250 = sbr.rel (!%p1170_p5) target bundleno = 29 (0x1d), region = 40  ;;  %s252_s18 = sand.u32 (%p1170_p5), 1, %s1061_s25  }
  0x16   : > { %s911_s19 = sshll.u32 (%p1170_p5), %s1077_s29, 3  ;;  %s910_s20 = sshll.u32 (%p1170_p5), %s252_s18, 4 }
  0x17   : > { %s256_s21 = sadd.s32 (%p1170_p5), %s1073_s28, %s911_s19  ;;  %s254_s14 = scalar_lea.vmem (%p1170_p5), [#allocation2], %s910_s20 }
  0x18   : > { %s912_s22 = sshll.u32 (%p1170_p5), %s256_s21, 2 }
  0x19   : > { %s258_s11 = scalar_lea.vmem (%p1170_p5), %s1330_s0, %s912_s22 }
  0x1a   : > { %v274_v0 = vld [vmem:[%s258_s11] sm:$0xf] (%p1170_p5)  ;;  %v276_v1 = vld [vmem:[%s258_s11 + $0x8] sm:$0xf] (%p1170_p5)  ;;  %v278_v2 = vld [vmem:[%s258_s11 + $0x10] sm:$0xf] (%p1170_p5) }
  0x1b   : > { %275 = vst [vmem:[%s254_s14] sm:$0xf] (%p1170_p5), %v274_v0  ;;  %277 = vst [vmem:[%s254_s14 + $0x4] sm:$0xf] (%p1170_p5), %v276_v1  ;;  %v280_v3 = vld [vmem:[%s258_s11 + $0x18] sm:$0xf] (%p1170_p5) }
  0x1c   : > { %279 = vst [vmem:[%s254_s14 + $0x8] sm:$0xf] %v278_v2  ;;  %281 = vst [vmem:[%s254_s14 + $0xc] sm:$0xf] %v280_v3 }
  0x1d PF: > { %312 = sbr.rel (!%p1170_p5) target bundleno = 39 (0x27), region = 81  ;;  %s314_s15 = sand.u32 (%p1170_p5), 1, %s1061_s25  }
  0x1e   : > { %s914_s16 = sshll.u32 (%p1170_p5), %s1077_s29, 4  ;;  %s913_s18 = sshll.u32 (%p1170_p5), %s314_s15, 6 }
  0x1f   : > { %s318_s19 = sadd.s32 (%p1170_p5), %s1073_s28, %s914_s16  ;;  %s316_s10 = scalar_lea.vmem (%p1170_p5), [#allocation3], %s913_s18 }
  0x20   : > { %s915_s21 = sshll.u32 (%p1170_p5), %s318_s19, 3 }
  0x21   : > { %s320_s20 = scalar_lea.vmem (%p1170_p5), %s1331_s1, %s915_s21 }
  0x22   : > { %v362_v4 = vld [vmem:[%s320_s20] sm:$0xff] (%p1170_p5)  ;;  %v364_v5 = vld [vmem:[%s320_s20 + $0x10] sm:$0xff] (%p1170_p5) }
  0x23   : > { %v366_v6 = vld [vmem:[%s320_s20 + $0x20] sm:$0xff] (%p1170_p5)  ;;  %363 = vst [vmem:[%s316_s10] sm:$0xff] (%p1170_p5), %v362_v4  ;;  %365 = vst [vmem:[%s316_s10 + $0x8] sm:$0xff] (%p1170_p5), %v364_v5  ;;  %v368_v7 = vld [vmem:[%s320_s20 + $0x30] sm:$0xff] (%p1170_p5) }
  0x24   : > { %367 = vst [vmem:[%s316_s10 + $0x10] sm:$0xff] %v366_v6  ;;  %v370_v8 = vld [vmem:[%s320_s20 + $0x40] sm:$0xff]  ;;  %v372_v9 = vld [vmem:[%s320_s20 + $0x50] sm:$0xff]  ;;  %369 = vst [vmem:[%s316_s10 + $0x18] sm:$0xff] %v368_v7 }
  0x25   : > { %371 = vst [vmem:[%s316_s10 + $0x20] sm:$0xff] %v370_v8  ;;  %373 = vst [vmem:[%s316_s10 + $0x28] sm:$0xff] %v372_v9  ;;  %v374_v10 = vld [vmem:[%s320_s20 + $0x60] sm:$0xff]  ;;  %v376_v11 = vld [vmem:[%s320_s20 + $0x70] sm:$0xff] }
  0x26   : > { %375 = vst [vmem:[%s316_s10 + $0x30] sm:$0xff] %v374_v10  ;;  %377 = vst [vmem:[%s316_s10 + $0x38] sm:$0xff] %v376_v11 }
  0x27 PF: > { %p916_p9 = scmp.ge.s32.totalorder %s1081_s30, 1  ;;  %p382_p10 = scmp.lt.s32.totalorder %s1081_s30, 5 }
  0x29   : > { %p383_p11 = pnand %p916_p9, %p382_p10 }
  0x2a   : > { %v467_v12 = vld [vmem:[%s1334_s4] sm:$0xff] (!%p383_p11)  ;;  %v1083_v14 = vmov (!%p383_p11), 0   ;;  %v468_v15 = vld [vmem:[%s1334_s4 + $0x8] sm:$0xff] (!%p383_p11)  ;;  %v442_v17 = vld [vmem:[%s1333_s3 + $0x18] sm:$0xff] (!%p383_p11)  ;;  %vm529_vm0 = vcmask (!%p383_p11), 261120   ;;  %s389_s16 = sand.u32 (!%p383_p11), 1, %s1057_s24  }
  0x2b   : > { %386 = sbr.rel (%p383_p11) target bundleno = 425 (0x1a9), region = 119  ;;  %v439_v13 = vld [vmem:[%s1333_s3] sm:$0xff] (!%p383_p11)  ;;  %1022 = vset.pattern.permute.xlu1 (!%p383_p11), %v1083_v14  ;;  %1021 = vset.pattern.permute.xlu0 (!%p383_p11), %v1083_v14  ;;  %v440_v16 = vld [vmem:[%s1333_s3 + $0x8] sm:$0xff] (!%p383_p11)  ;;  %v441_v18 = vld [vmem:[%s1333_s3 + $0x10] sm:$0xff] (!%p383_p11)  ;;  %s917_s18 = sshll.u32 (!%p383_p11), %s389_s16, 4 }
  0x2c   : > { %473 = vperm.xlu1 (!%p383_p11), %1022, %v467_v12   ;;  %445 = vperm.xlu0 (!%p383_p11), %1021, %v439_v13   ;;  %v470_v19 = vld [vmem:[%s1334_s4 + $0x18] sm:$0xff] (!%p383_p11)  ;;  %v469_v20 = vld [vmem:[%s1334_s4 + $0x10] sm:$0xff] (!%p383_p11)  ;;  %v608_v21 = vld [vmem:[%s1335_s5 + $0x8] sm:$0xff] (!%p383_p11)  ;;  %s391_s19 = scalar_lea.vmem (!%p383_p11), [#allocation2], %s917_s18  ;;  %s1298_s10 = sshll.u32 (!%p383_p11), %s389_s16, 6 }
  0x2d   : > { %v607_v22 = vld [vmem:[%s1335_s5] sm:$0xff] (!%p383_p11)  ;;  %v610_v23 = vld [vmem:[%s1335_s5 + $0x18] sm:$0xff] (!%p383_p11)  ;;  %v609_v24 = vld [vmem:[%s1335_s5 + $0x10] sm:$0xff] (!%p383_p11)  ;;  %s398_s12 = scalar_lea.vmem (!%p383_p11), [#allocation3], %s1298_s10  ;;  %s429_s24 = scalar_lea.vmem (!%p383_p11), [#allocation4], %s1298_s10 }
  0x2e   : > { %v1023_v25 = vld [vmem:[%s1332_s2] sm:$0xff] (!%p383_p11)   ;;  %v1024_v26 = vld [vmem:[%s1332_s2 + $0x10] sm:$0xff] (!%p383_p11)   ;;  %v612_v27 = vld [vmem:[%s1335_s5 + $0x28] sm:$0xff] (!%p383_p11) }
  0x2f   : > { %v611_v28 = vld [vmem:[%s1335_s5 + $0x20] sm:$0xff] (!%p383_p11)  ;;  %952 = vmatprep.mubr.msk.bf16.mxu0 (!%p383_p11), %vm529_vm0, %v1023_v25  ;;  %956 = vmatprep.mubr.msk.bf16.mxu1 (!%p383_p11), %vm529_vm0, %v1024_v26  ;;  %v614_v29 = vld [vmem:[%s1335_s5 + $0x38] sm:$0xff] (!%p383_p11)  ;;  %v613_v30 = vld [vmem:[%s1335_s5 + $0x30] sm:$0xff] (!%p383_p11) }
  0x30   : > { %478 = vperm.xlu1 (!%p383_p11), %1022, %v468_v15   ;;  %450 = vperm.xlu0 (!%p383_p11), %1021, %v440_v16   ;;  %v664_v31 = vld [vmem:[%s1336_s6 + $0x8] sm:$0xff] (!%p383_p11)  ;;  %v663_v32 = vld [vmem:[%s1336_s6] sm:$0xff] (!%p383_p11)  ;;  %v666_v33 = vld [vmem:[%s1336_s6 + $0x18] sm:$0xff] (!%p383_p11) }
  0x31   : > { %v665_v34 = vld [vmem:[%s1336_s6 + $0x10] sm:$0xff] (!%p383_p11)  ;;  %v668_v35 = vld [vmem:[%s1336_s6 + $0x28] sm:$0xff] (!%p383_p11)  ;;  %v667_v36 = vld [vmem:[%s1336_s6 + $0x20] sm:$0xff] (!%p383_p11) }
  0x32   : > { %v670_v37 = vld [vmem:[%s1336_s6 + $0x38] sm:$0xff]  ;;  %v669_v38 = vld [vmem:[%s1336_s6 + $0x30] sm:$0xff]  ;;  %v1025_v3 = vld [vmem:[%s1332_s2 + $0x8] sm:$0xff]   ;;  %s929_s11 = sshll.u32 (%p1176_p6), %s1069_s27, 4 }
  0x33   : > { %v934_v39 = vld [vmem:[%s391_s19] sm:$0xff]   ;;  %v941_v47 = vld [vmem:[%s391_s19 + $0x8] sm:$0xff]   ;;  %s751_s14 = sadd.s32 (%p1176_p6), %s1065_s26, %s929_s11 }
  0x34   : > { %460 = vperm.xlu1 %1022, %v442_v17   ;;  %455 = vperm.xlu0 %1021, %v441_v18   ;;  %v935_v40 = vunpack.c.l.bf16 %v934_v39  ;;  %v936_v44 = vunpack.c.h.bf16 %v934_v39  ;;  %v940_v51 = vunpack.c.h.bf16 %v941_v47  ;;  %v939_v52 = vunpack.c.l.bf16 %v941_v47  ;;  %v1026_v4 = vld [vmem:[%s1332_s2 + $0x18] sm:$0xff]   ;;  %v721_v26 = vld [vmem:[%s398_s12 + $0x10] sm:$0xff]  ;;  %s930_s15 = sshll.u32 (%p1176_p6), %s751_s14, 3 }
  0x35   : > { %s753_s19 = scalar_lea.vmem (%p1176_p6), %s1337_s7, %s930_s15 }
  0x38   : > { %488 = vperm.xlu1 %1022, %v470_v19   ;;  %483 = vperm.xlu0 %1021, %v469_v20  }
  0x3c   : > { %622 = vperm.xlu1 %1022, %v608_v21   ;;  %617 = vperm.xlu0 %1021, %v607_v22  }
  0x40   : > { %632 = vperm.xlu1 %1022, %v610_v23   ;;  %627 = vperm.xlu0 %1021, %v609_v24  }
  0x44   : > { %642 = vperm.xlu1 %1022, %v612_v27   ;;  %637 = vperm.xlu0 %1021, %v611_v28   ;;  %v725_v27 = vld [vmem:[%s398_s12 + $0x30] sm:$0xff] }
  0x48   : > { %652 = vperm.xlu1 %1022, %v614_v29   ;;  %647 = vperm.xlu0 %1021, %v613_v30  }
  0x4c   : > { %678 = vperm.xlu1 %1022, %v664_v31   ;;  %673 = vperm.xlu0 %1021, %v663_v32  }
  0x50   : > { %688 = vperm.xlu1 %1022, %v666_v33   ;;  %683 = vperm.xlu0 %1021, %v665_v34   ;;  %v719_v34 = vld [vmem:[%s398_s12] sm:$0xff] }
  0x54   : > { %698 = vperm.xlu1 %1022, %v668_v35   ;;  %693 = vperm.xlu0 %1021, %v667_v36   ;;  %v723_v35 = vld [vmem:[%s398_s12 + $0x20] sm:$0xff] }
  0x58   : > { %708 = vperm.xlu1 %1022, %v670_v37   ;;  %703 = vperm.xlu0 %1021, %v669_v38  }
  0xab   : > { %v474_v41 = vpop.permute.xlu1 %473  ;;  %v446_v42 = vpop.permute.xlu0 %445 }
  0xac   : > { %v463_v43 = vmul.f32 %v935_v40, %v446_v42 }
  0xae   : > { %v491_v48 = vadd.f32 %v474_v41, %v463_v43  ;;  %v722_v43 = vld [vmem:[%s398_s12 + $0x18] sm:$0xff] }
  0xaf   : > { %v479_v45 = vpop.permute.xlu1 %478  ;;  %v451_v46 = vpop.permute.xlu0 %450 }
  0xb0   : > { %v464_v49 = vmul.f32 %v936_v44, %v451_v46  ;;  %v495_v55 = vmax.f32 %v491_v48, 0.0  ;;  %v726_v44 = vld [vmem:[%s398_s12 + $0x38] sm:$0xff] }
  0xb2   : > { %v492_v50 = vadd.f32 %v479_v45, %v464_v49 }
  0xb3   : > { %v461_v53 = vpop.permute.xlu1 %460  ;;  %v456_v54 = vpop.permute.xlu0 %455 }
  0xb4   : > { %v496_v56 = vmax.f32 %v492_v50, 0.0  ;;  %v466_v58 = vmul.f32 %v940_v51, %v461_v53  ;;  %v465_v59 = vmul.f32 %v939_v52, %v456_v54  ;;  %v720_v51 = vld [vmem:[%s398_s12 + $0x8] sm:$0xff] }
  0xb5   : > { %v724_v52 = vld [vmem:[%s398_s12 + $0x28] sm:$0xff] }
  0xb6   : > { %v499_v57 = vpack.c.bf16 %v496_v56, %v495_v55 }
  0xb7   : > { %v489_v60 = vpop.permute.xlu1 %488  ;;  %v484_v61 = vpop.permute.xlu0 %483 }
  0xb8   : > { %v494_v62 = vadd.f32 %v489_v60, %v466_v58  ;;  %v493_v63 = vadd.f32 %v484_v61, %v465_v59  ;;  %948 = vmatprep.subr.bf16.mxu0 %v499_v57  ;;  %960 = vmatprep.subr.bf16.mxu1 %v499_v57 }
  0xb9   : > { %949 = vmatpush3.bf16.msra.mxu0 %v499_v57  ;;  %962 = vmatpush3.bf16.msra.mxu1 %v499_v57 }
  0xba   : > { %v498_v0 = vmax.f32 %v494_v62, 0.0  ;;  %v497_v1 = vmax.f32 %v493_v63, 0.0 }
  0xbb   : > { %v618_v5 = vpop.permute.xlu0 %617  ;;  %v623_v6 = vpop.permute.xlu1 %622 }
  0xbc   : > { %v500_v2 = vpack.c.bf16 %v498_v0, %v497_v1 }
  0xbe   : > { %950 = vmatprep.subr.bf16.mxu0 %v500_v2  ;;  %961 = vmatprep.subr.bf16.mxu1 %v500_v2 }
  0xbf   : > { %951 = vmatpush3.bf16.msra.mxu0 %v500_v2  ;;  %963 = vmatpush3.bf16.msra.mxu1 %v500_v2  ;;  %v628_v7 = vpop.permute.xlu0 %627  ;;  %v633_v8 = vpop.permute.xlu1 %632 }
  0xc2   : > { %953 = vmatmul.mubr.msk.bf16.vlgmr.msra.gmra.mrb[0].mxu0 %vm529_vm0, %v1025_v3  ;;  %957 = vmatmul.mubr.msk.bf16.vlgmr.msra.gmra.mrb[0].mxu1 %vm529_vm0, %v1026_v4 }
  0xc3   : > { %v638_v9 = vpop.permute.xlu0 %637  ;;  %v643_v10 = vpop.permute.xlu1 %642 }
  0xc7   : > { %v648_v11 = vpop.permute.xlu0 %647  ;;  %v653_v12 = vpop.permute.xlu1 %652 }
  0xcb   : > { %v674_v13 = vpop.permute.xlu0 %673  ;;  %v679_v14 = vpop.permute.xlu1 %678 }
  0xcf   : > { %v684_v15 = vpop.permute.xlu0 %683  ;;  %v689_v16 = vpop.permute.xlu1 %688 }
  0xd3   : > { %v694_v17 = vpop.permute.xlu0 %693  ;;  %v699_v18 = vpop.permute.xlu1 %698 }
  0xd7   : > { %v704_v19 = vpop.permute.xlu0 %703  ;;  %v709_v40 = vpop.permute.xlu1 %708 }
 0x195   : > { %v954_v20 = vpop.f32.mrb[0].mxu0  ;;  %v958_v21 = vpop.f32.mrb[0].mxu1 }
 0x196   : > { %v657_v22 = vmul.f32 %v954_v20, %v628_v7  ;;  %v661_v23 = vmul.f32 %v958_v21, %v648_v11  ;;  %v576_v24 = vpop.f32.mrb[1].mxu0  ;;  %v592_v25 = vpop.f32.mrb[1].mxu1 }
 0x197   : > { %v655_v28 = vmul.f32 %v618_v5, %v576_v24  ;;  %v659_v29 = vmul.f32 %v638_v9, %v592_v25  ;;  %v955_v30 = vpop.f32.mrb[2].mxu0  ;;  %v959_v31 = vpop.f32.mrb[2].mxu1 }
 0x198   : > { %v713_v32 = vadd.f32 %v684_v15, %v657_v22  ;;  %v717_v33 = vadd.f32 %v704_v19, %v661_v23  ;;  %v658_v36 = vmul.f32 %v955_v30, %v633_v8  ;;  %v662_v37 = vmul.f32 %v959_v31, %v653_v12  ;;  %v579_v38 = vpop.f32.mrb[3].mxu0  ;;  %v595_v39 = vpop.f32.mrb[3].mxu1 }
 0x199   : > { %v711_v41 = vadd.f32 %v674_v13, %v655_v28  ;;  %v715_v42 = vadd.f32 %v694_v17, %v659_v29  ;;  %v656_v45 = vmul.f32 %v623_v6, %v579_v38  ;;  %v660_v46 = vmul.f32 %v643_v10, %v595_v39  ;;  %749 = sbr.rel (!%p1176_p6) target bundleno = 425 (0x1a9), region = 131 }
 0x19a   : > { %v729_v47 = vadd.f32 %v721_v26, %v713_v32  ;;  %v733_v48 = vadd.f32 %v725_v27, %v717_v33  ;;  %v714_v49 = vadd.f32 %v689_v16, %v658_v36  ;;  %v718_v50 = vadd.f32 %v709_v40, %v662_v37 }
 0x19b   : > { %v727_v53 = vadd.f32 %v719_v34, %v711_v41  ;;  %v731_v54 = vadd.f32 %v723_v35, %v715_v42  ;;  %v712_v55 = vadd.f32 %v679_v14, %v656_v45  ;;  %v716_v56 = vadd.f32 %v699_v18, %v660_v46 }
 0x19c   : > { %737 = vst [vmem:[%s429_s24 + $0x10] sm:$0xff] %v729_v47  ;;  %741 = vst [vmem:[%s429_s24 + $0x30] sm:$0xff] %v733_v48  ;;  %v730_v57 = vadd.f32 %v722_v43, %v714_v49  ;;  %v734_v58 = vadd.f32 %v726_v44, %v718_v50 }
 0x19d   : > { %735 = vst [vmem:[%s429_s24] sm:$0xff] %v727_v53  ;;  %739 = vst [vmem:[%s429_s24 + $0x20] sm:$0xff] %v731_v54  ;;  %v728_v59 = vadd.f32 %v720_v51, %v712_v55  ;;  %v732_v60 = vadd.f32 %v724_v52, %v716_v56 }
 0x19e   : > { %738 = vst [vmem:[%s429_s24 + $0x18] sm:$0xff] %v730_v57  ;;  %742 = vst [vmem:[%s429_s24 + $0x38] sm:$0xff] %v734_v58 }
 0x19f   : > { %736 = vst [vmem:[%s429_s24 + $0x8] sm:$0xff] %v728_v59  ;;  %740 = vst [vmem:[%s429_s24 + $0x28] sm:$0xff] %v732_v60 }
 0x1a3   : > { %v799_v63 = vld [vmem:[%s429_s24 + $0x10] sm:$0xff] }
 0x1a4   : > { %v795_v61 = vld [vmem:[%s429_s24] sm:$0xff]  ;;  %v807_v3 = vld [vmem:[%s429_s24 + $0x30] sm:$0xff]  ;;  %800 = vst [vmem:[%s753_s19 + $0x20] sm:$0xff] %v799_v63 }
 0x1a5   : > { %v801_v0 = vld [vmem:[%s429_s24 + $0x18] sm:$0xff]  ;;  %v803_v1 = vld [vmem:[%s429_s24 + $0x20] sm:$0xff]  ;;  %796 = vst [vmem:[%s753_s19] sm:$0xff] %v795_v61  ;;  %808 = vst [vmem:[%s753_s19 + $0x60] sm:$0xff] %v807_v3 }
 0x1a6   : > { %v797_v62 = vld [vmem:[%s429_s24 + $0x8] sm:$0xff]  ;;  %v809_v4 = vld [vmem:[%s429_s24 + $0x38] sm:$0xff]  ;;  %802 = vst [vmem:[%s753_s19 + $0x30] sm:$0xff] %v801_v0  ;;  %804 = vst [vmem:[%s753_s19 + $0x40] sm:$0xff] %v803_v1 }
 0x1a7   : > { %v805_v2 = vld [vmem:[%s429_s24 + $0x28] sm:$0xff]  ;;  %798 = vst [vmem:[%s753_s19 + $0x10] sm:$0xff] %v797_v62  ;;  %810 = vst [vmem:[%s753_s19 + $0x70] sm:$0xff] %v809_v4 }
 0x1a8   : > { %806 = vst [vmem:[%s753_s19 + $0x50] sm:$0xff] %v805_v2 }
 0x1a9 PF: > { %s17_s30 = sadd.s32 1, %s1081_s30   ;;  %s1340_s24 = smov %s1061_s25 }
 0x1aa   : > { %p14_p12 = scmp.ge.s32.totalorder %s17_s30, 6   ;;  %s1341_s25 = smov %s1184_s17 }
 0x1ab   : > { %s1342_s26 = smov %s1073_s28  ;;  %s1343_s27 = smov %s1077_s29 }
 0x1ac   : > { %s1344_s28 = smov %s1347_s8  ;;  %s1345_s29 = smov %s1351_s9 }
 0x1ad   :  { %16 = sbr.rel (!%p14_p12) target bundleno = 4 (0x4), region = 208 }

</bundles_post_ra>
